<compile_context>
chip_gen: v7x
topology: tpu7x:2x2x1
jax: 0.10.0
libtpu: 0.0.40
codegen_flags: <defaults>
</compile_context>

<pallas_src>
import functools

import jax
import jax.numpy as jnp
import numpy as np
from jax.experimental import pallas as pl
from jax.experimental.pallas import tpu as pltpu

# ----------------------------- config -------------------------------------
CFG = dict(
    emb_dim=128,          # small but lane-aligned (multiple of 128)
    context_length=8,
    n_heads=4,
    drop_rate=0.0,        # dropout is identity in eval mode anyway
    qkv_bias=False,
)
BATCH = 2
SEQ = 8                   # num_tokens <= context_length

NEG_BIG = -1e30           # finite additive mask (safe: max-subtracted -> exp==0)


# --------------------------- kernel helpers --------------------------------
def _gelu(x):
    # exactly as written in the PyTorch module (note 0.44715, not 0.044715)
    return 0.5 * x * (1.0 + jnp.tanh(jnp.sqrt(2.0 / jnp.pi) * (x + 0.44715 * x * x * x)))


def _norm(x, eps=1e-5):
    # LayerNorm WITHOUT affine: scale/shift are folded into the downstream
    # projection weights in pack_params (numerically identical).
    mean = jnp.mean(x, axis=-1, keepdims=True)
    var = jnp.mean((x - mean) ** 2, axis=-1, keepdims=True)   # unbiased=False
    return (x - mean) * jax.lax.rsqrt(var + eps)


# ------------------------------ kernel -------------------------------------
def transformer_block_kernel(x_ref,
                             wqkv_ref, bqkv_ref, wo_ref, bo_ref,
                             w1_ref, b1_ref, w2_ref, b2_ref,
                             hmask_ref, seg_ref, bias_ref,
                             o_ref, *, num_heads):
    x = x_ref[...]                        # (BT, E), f32
    emb = x.shape[1]

    # ---------------- norm1 (affine folded) + multi-head attention ---------
    xn = _norm(x)
    # Fused QKV projection: one (BT,E)@(E,3E) MXU matmul.  The 1/sqrt(head_dim)
    # scale and the LN1 affine are already folded into wqkv/bqkv (wrapper).
    qkv = jnp.dot(xn, wqkv_ref[...], preferred_element_type=jnp.float32) + bqkv_ref[...]
    q = qkv[:, 0 * emb:1 * emb]           # 128-lane-aligned slices
    k = qkv[:, 1 * emb:2 * emb]
    v = qkv[:, 2 * emb:3 * emb]

    # Block-diagonal K / V: heads stacked along sublanes, masked so row block h
    # keeps only head h's feature columns.  Shape (H*BT, E).
    hmask = hmask_ref[...]
    k_bd = jnp.concatenate([k] * num_heads, axis=0) * hmask
    v_bd = jnp.concatenate([v] * num_heads, axis=0) * hmask

    # All heads' scores in ONE full-depth (K=E) MXU pass: (BT, H*BT);
    # lane block h holds q_h @ k_h^T.
    s = jax.lax.dot_general(q, k_bd,
                            dimension_numbers=(((1,), (1,)), ((), ())),
                            preferred_element_type=jnp.float32)
    s = s + bias_ref[...]                 # causal + batch bias, tiled per head

    # Single-launch softmax over the combined tile.  The global row max is a
    # per-row constant, so subtracting it leaves each head's (segmented)
    # softmax mathematically unchanged; masked entries underflow to exactly 0.
    s = s - jnp.max(s, axis=-1, keepdims=True)
    p = jnp.exp(s)
    # Per-head denominators via one matmul with a 0/1 segment matrix.
    den = jnp.dot(p, seg_ref[...], preferred_element_type=jnp.float32)
    p = p * pl.reciprocal(den, approx=True)
    # TODO(synk): attention / shortcut dropout omitted (drop_rate=0, eval mode).

    # All heads' context + output projection in two full-width matmuls.
    ctx = jnp.dot(p, v_bd, preferred_element_type=jnp.float32)              # (BT, E)
    attn = jnp.dot(ctx, wo_ref[...], preferred_element_type=jnp.float32) + bo_ref[...]
    x1 = x + attn

    # ---------------- norm2 (affine folded) + feed-forward ----------------
    xn2 = _norm(x1)
    hid = jnp.dot(xn2, w1_ref[...], preferred_element_type=jnp.float32) + b1_ref[...]
    hid = _gelu(hid)
    ff = jnp.dot(hid, w2_ref[...], preferred_element_type=jnp.float32) + b2_ref[...]

    o_ref[...] = x1 + ff


# --------------------------- one-time packing -------------------------------
def pack_params(params, num_heads, batch, seq):
    """Hoisted out of the per-call path: call once and reuse."""
    E = params["wq"].shape[0]
    head_dim = E // num_heads
    bt = batch * seq
    inv_scale = 1.0 / np.sqrt(np.float32(head_dim))

    # Fused QKV with the softmax scale folded into the Q columns, plus the
    # LayerNorm-1 affine folded in: xn@W = norm@(diag(g1)@W) + (s1@W).
    wqkv = jnp.concatenate(
        [params["wq"] * inv_scale, params["wk"], params["wv"]], axis=1)      # (E, 3E)
    bqkv = params["s1"].reshape(1, E) @ wqkv                                  # (1, 3E)
    wqkv = params["g1"].reshape(E, 1) * wqkv

    # LayerNorm-2 affine folded into the first FF layer.
    b1 = params["s2"].reshape(1, E) @ params["w1"] + params["b1"]             # (1, 4E)
    w1 = params["g2"].reshape(E, 1) * params["w1"]

    # Head block-diagonal mask: row block h keeps only head h's feature cols.
    r = np.arange(num_heads * bt)[:, None]
    c = np.arange(E)[None, :]
    hmask = jnp.asarray((r // bt) == (c // head_dim), jnp.float32)            # (H*BT, E)

    # Softmax segment matrix (per-head denominator via one matmul).
    rr = np.arange(num_heads * bt)[:, None]
    cc = np.arange(num_heads * bt)[None, :]
    seg = jnp.asarray((rr // bt) == (cc // bt), jnp.float32)                  # (H*BT, H*BT)

    # Causal + batch-separation additive bias over the flattened (BT, BT)
    # score block, tiled once per head along lanes.
    ri = np.arange(bt)[:, None]
    ci = np.arange(bt)[None, :]
    allowed = (ri // seq == ci // seq) & (ci <= ri)
    bias = np.where(allowed, 0.0, NEG_BIG).astype(np.float32)
    bias = jnp.asarray(np.tile(bias, (1, num_heads)))                         # (BT, H*BT)

    return dict(wqkv=wqkv, bqkv=bqkv, wo=params["wo"], bo=params["bo"],
                w1=w1, b1=b1, w2=params["w2"], b2=params["b2"],
                hmask=hmask, seg=seg, bias=bias)


# ------------------------------ wrapper ------------------------------------
def transformer_block(x, packed, num_heads):
    B, T, E = x.shape
    x2d = x.reshape(B * T, E)

    kernel = functools.partial(transformer_block_kernel, num_heads=num_heads)
    vmem = lambda: pl.BlockSpec(memory_space=pltpu.MemorySpace.VMEM)

    out2d = pl.pallas_call(
        kernel,
        out_shape=jax.ShapeDtypeStruct((B * T, E), jnp.float32),
        in_specs=[vmem() for _ in range(12)],
        out_specs=vmem(),
        # TODO(synk): at this size (16 rows, <1 MiB resident) a row-block grid
        # (for v7x's 2nd TensorCore) and bf16 weight casts cost more than they
        # save; add them only if the block is scaled up.
    )(x2d,
      packed["wqkv"], packed["bqkv"], packed["wo"], packed["bo"],
      packed["w1"], packed["b1"], packed["w2"], packed["b2"],
      packed["hmask"], packed["seg"], packed["bias"])

    return out2d.reshape(B, T, E)


# --------------------------- reference (pure JAX) ---------------------------
def reference_block(x, p, num_heads):
    B, T, E = x.shape
    hd = E // num_heads

    def ln(x, g, s):
        m = x.mean(-1, keepdims=True)
        v = ((x - m) ** 2).mean(-1, keepdims=True)
        return g * (x - m) / jnp.sqrt(v + 1e-5) + s

    xn = ln(x, p["g1"], p["s1"])
    q = xn @ p["wq"]
    k = xn @ p["wk"]
    v = xn @ p["wv"]
    q = q.reshape(B, T, num_heads, hd).transpose(0, 2, 1, 3)
    k = k.reshape(B, T, num_heads, hd).transpose(0, 2, 1, 3)
    v = v.reshape(B, T, num_heads, hd).transpose(0, 2, 1, 3)
    scores = q @ k.transpose(0, 1, 3, 2)
    mask = jnp.triu(jnp.ones((T, T), bool), k=1)
    scores = jnp.where(mask, -jnp.inf, scores)
    w = jax.nn.softmax(scores / jnp.sqrt(jnp.float32(hd)), axis=-1)
    ctx = (w @ v).transpose(0, 2, 1, 3).reshape(B, T, E)
    attn = ctx @ p["wo"] + p["bo"]
    x1 = x + attn
    xn2 = ln(x1, p["g2"], p["s2"])
    h = xn2 @ p["w1"] + p["b1"]
    h = 0.5 * h * (1 + jnp.tanh(jnp.sqrt(2.0 / jnp.pi) * (h + 0.44715 * h ** 3)))
    ff = h @ p["w2"] + p["b2"]
    return x1 + ff


# ------------------------------- main ---------------------------------------
if __name__ == "__main__":
    E = CFG["emb_dim"]
    H4 = 4 * E
    key = jax.random.PRNGKey(0)
    keys = jax.random.split(key, 10)

    def init(k, shape, scale=0.05):
        return (scale * jax.random.normal(k, shape)).astype(jnp.float32)

    params = {
        "wq": init(keys[0], (E, E)),
        "wk": init(keys[1], (E, E)),
        "wv": init(keys[2], (E, E)),
        "wo": init(keys[3], (E, E)),
        "bo": init(keys[4], (1, E)),
        "w1": init(keys[5], (E, H4)),
        "b1": init(keys[6], (1, H4)),
        "w2": init(keys[7], (H4, E)),
        "b2": init(keys[8], (1, E)),
        "g1": jnp.ones((1, E), jnp.float32),
        "s1": jnp.zeros((1, E), jnp.float32),
        "g2": jnp.ones((1, E), jnp.float32),
        "s2": jnp.zeros((1, E), jnp.float32),
    }

    x = jax.random.uniform(keys[9], (BATCH, SEQ, E), dtype=jnp.float32)

    packed = pack_params(params, CFG["n_heads"], BATCH, SEQ)   # once, reused

    out = jax.block_until_ready(transformer_block(x, packed, CFG["n_heads"]))
    ref = jax.block_until_ready(reference_block(x, params, CFG["n_heads"]))

    # slightly loosened tolerance: approx (EUP) reciprocal in the softmax
    np.testing.assert_allclose(np.asarray(out), np.asarray(ref),
                               rtol=2e-3, atol=2e-3)
    print("KERNEL_OK")
</pallas_src>

<mosaic_0001>
module attributes {stable_mosaic.version = 11 : i64} {
  func.func @transformer_block_kernel(%arg0: memref<16x128xf32, #tpu.memory_space<vmem>>, %arg1: memref<128x384xf32, #tpu.memory_space<vmem>>, %arg2: memref<1x384xf32, #tpu.memory_space<vmem>>, %arg3: memref<128x128xf32, #tpu.memory_space<vmem>>, %arg4: memref<1x128xf32, #tpu.memory_space<vmem>>, %arg5: memref<128x512xf32, #tpu.memory_space<vmem>>, %arg6: memref<1x512xf32, #tpu.memory_space<vmem>>, %arg7: memref<512x128xf32, #tpu.memory_space<vmem>>, %arg8: memref<1x128xf32, #tpu.memory_space<vmem>>, %arg9: memref<64x128xf32, #tpu.memory_space<vmem>>, %arg10: memref<64x64xf32, #tpu.memory_space<vmem>>, %arg11: memref<16x64xf32, #tpu.memory_space<vmem>>, %arg12: memref<16x128xf32, #tpu.memory_space<vmem>>) attributes {dimension_semantics = [], scalar_prefetch = 0 : i64, scratch_operands = 0 : i64, tpu.core_type = #tpu.core_type<tc>} {
    %c0 = arith.constant 0 : index
    %c0_0 = arith.constant 0 : index
    %0 = vector.load %arg0[%c0, %c0_0] : memref<16x128xf32, #tpu.memory_space<vmem>>, vector<16x128xf32>
    %cst = arith.constant dense<0.000000e+00> : vector<16xf32>
    %1 = vector.multi_reduction <add>, %0, %cst [1] : vector<16x128xf32> to vector<16xf32>
    %2 = vector.shape_cast %1 : vector<16xf32> to vector<16x1xf32>
    %cst_1 = arith.constant 1.280000e+02 : f32
    %3 = vector.broadcast %cst_1 : f32 to vector<16x1xf32>
    %4 = arith.divf %2, %3 : vector<16x1xf32>
    %5 = vector.broadcast %4 : vector<16x1xf32> to vector<16x128xf32>
    %6 = arith.subf %0, %5 : vector<16x128xf32>
    %7 = arith.mulf %6, %6 : vector<16x128xf32>
    %cst_2 = arith.constant dense<0.000000e+00> : vector<16xf32>
    %8 = vector.multi_reduction <add>, %7, %cst_2 [1] : vector<16x128xf32> to vector<16xf32>
    %9 = vector.shape_cast %8 : vector<16xf32> to vector<16x1xf32>
    %cst_3 = arith.constant 1.280000e+02 : f32
    %10 = vector.broadcast %cst_3 : f32 to vector<16x1xf32>
    %11 = arith.divf %9, %10 : vector<16x1xf32>
    %12 = vector.broadcast %4 : vector<16x1xf32> to vector<16x128xf32>
    %13 = arith.subf %0, %12 : vector<16x128xf32>
    %cst_4 = arith.constant 9.99999974E-6 : f32
    %14 = vector.broadcast %cst_4 : f32 to vector<16x1xf32>
    %15 = arith.addf %11, %14 : vector<16x1xf32>
    %16 = math.rsqrt %15 : vector<16x1xf32>
    %17 = vector.broadcast %16 : vector<16x1xf32> to vector<16x128xf32>
    %18 = arith.mulf %13, %17 : vector<16x128xf32>
    %c0_5 = arith.constant 0 : index
    %c0_6 = arith.constant 0 : index
    %19 = vector.load %arg1[%c0_5, %c0_6] : memref<128x384xf32, #tpu.memory_space<vmem>>, vector<128x384xf32>
    %cst_7 = arith.constant dense<0.000000e+00> : vector<16x384xf32>
    %20 = tpu.matmul %18, %19, %cst_7 {dimension_numbers = #tpu.dot_dimension_numbers<[1], [0], [0], [1], [0, 0, 1, 1], [], []>} : vector<16x128xf32>, vector<128x384xf32>, vector<16x384xf32> -> vector<16x384xf32>
    %c0_8 = arith.constant 0 : index
    %c0_9 = arith.constant 0 : index
    %21 = vector.load %arg2[%c0_8, %c0_9] : memref<1x384xf32, #tpu.memory_space<vmem>>, vector<1x384xf32>
    %22 = vector.broadcast %21 : vector<1x384xf32> to vector<16x384xf32>
    %23 = arith.addf %20, %22 : vector<16x384xf32>
    %24 = vector.extract_strided_slice %23 {offsets = [0, 0], sizes = [16, 128], strides = [1, 1]} : vector<16x384xf32> to vector<16x128xf32>
    %25 = vector.extract_strided_slice %23 {offsets = [0, 128], sizes = [16, 128], strides = [1, 1]} : vector<16x384xf32> to vector<16x128xf32>
    %26 = vector.extract_strided_slice %23 {offsets = [0, 256], sizes = [16, 128], strides = [1, 1]} : vector<16x384xf32> to vector<16x128xf32>
    %c0_10 = arith.constant 0 : index
    %c0_11 = arith.constant 0 : index
    %27 = vector.load %arg9[%c0_10, %c0_11] : memref<64x128xf32, #tpu.memory_space<vmem>>, vector<64x128xf32>
    %28 = tpu.concatenate %25, %25, %25, %25 in 0 : vector<16x128xf32>, vector<16x128xf32>, vector<16x128xf32>, vector<16x128xf32> -> vector<64x128xf32>
    %29 = arith.mulf %28, %27 : vector<64x128xf32>
    %30 = tpu.concatenate %26, %26, %26, %26 in 0 : vector<16x128xf32>, vector<16x128xf32>, vector<16x128xf32>, vector<16x128xf32> -> vector<64x128xf32>
    %31 = arith.mulf %30, %27 : vector<64x128xf32>
    %cst_12 = arith.constant dense<0.000000e+00> : vector<16x64xf32>
    %32 = tpu.matmul %24, %29, %cst_12 {dimension_numbers = #tpu.dot_dimension_numbers<[1], [1], [0], [0], [0, 0, 1, 0], [], []>} : vector<16x128xf32>, vector<64x128xf32>, vector<16x64xf32> -> vector<16x64xf32>
    %c0_13 = arith.constant 0 : index
    %c0_14 = arith.constant 0 : index
    %33 = vector.load %arg11[%c0_13, %c0_14] : memref<16x64xf32, #tpu.memory_space<vmem>>, vector<16x64xf32>
    %34 = arith.addf %32, %33 : vector<16x64xf32>
    %cst_15 = arith.constant dense<0xFF800000> : vector<16xf32>
    %35 = vector.multi_reduction <maximumf>, %34, %cst_15 [1] : vector<16x64xf32> to vector<16xf32>
    %36 = vector.shape_cast %35 : vector<16xf32> to vector<16x1xf32>
    %37 = vector.broadcast %36 : vector<16x1xf32> to vector<16x64xf32>
    %38 = arith.subf %34, %37 : vector<16x64xf32>
    %39 = math.exp %38 : vector<16x64xf32>
    %c0_16 = arith.constant 0 : index
    %c0_17 = arith.constant 0 : index
    %40 = vector.load %arg10[%c0_16, %c0_17] : memref<64x64xf32, #tpu.memory_space<vmem>>, vector<64x64xf32>
    %cst_18 = arith.constant dense<0.000000e+00> : vector<16x64xf32>
    %41 = tpu.matmul %39, %40, %cst_18 {dimension_numbers = #tpu.dot_dimension_numbers<[1], [0], [0], [1], [0, 0, 1, 1], [], []>} : vector<16x64xf32>, vector<64x64xf32>, vector<16x64xf32> -> vector<16x64xf32>
    %42 = tpu.reciprocal %41 {approx = true} : vector<16x64xf32> -> vector<16x64xf32>
    %43 = arith.mulf %39, %42 : vector<16x64xf32>
    %cst_19 = arith.constant dense<0.000000e+00> : vector<16x128xf32>
    %44 = tpu.matmul %43, %31, %cst_19 {dimension_numbers = #tpu.dot_dimension_numbers<[1], [0], [0], [1], [0, 0, 1, 1], [], []>} : vector<16x64xf32>, vector<64x128xf32>, vector<16x128xf32> -> vector<16x128xf32>
    %c0_20 = arith.constant 0 : index
    %c0_21 = arith.constant 0 : index
    %45 = vector.load %arg3[%c0_20, %c0_21] : memref<128x128xf32, #tpu.memory_space<vmem>>, vector<128x128xf32>
    %cst_22 = arith.constant dense<0.000000e+00> : vector<16x128xf32>
    %46 = tpu.matmul %44, %45, %cst_22 {dimension_numbers = #tpu.dot_dimension_numbers<[1], [0], [0], [1], [0, 0, 1, 1], [], []>} : vector<16x128xf32>, vector<128x128xf32>, vector<16x128xf32> -> vector<16x128xf32>
    %c0_23 = arith.constant 0 : index
    %c0_24 = arith.constant 0 : index
    %47 = vector.load %arg4[%c0_23, %c0_24] : memref<1x128xf32, #tpu.memory_space<vmem>>, vector<1x128xf32>
    %48 = vector.broadcast %47 : vector<1x128xf32> to vector<16x128xf32>
    %49 = arith.addf %46, %48 : vector<16x128xf32>
    %50 = arith.addf %0, %49 : vector<16x128xf32>
    %cst_25 = arith.constant dense<0.000000e+00> : vector<16xf32>
    %51 = vector.multi_reduction <add>, %50, %cst_25 [1] : vector<16x128xf32> to vector<16xf32>
    %52 = vector.shape_cast %51 : vector<16xf32> to vector<16x1xf32>
    %cst_26 = arith.constant 1.280000e+02 : f32
    %53 = vector.broadcast %cst_26 : f32 to vector<16x1xf32>
    %54 = arith.divf %52, %53 : vector<16x1xf32>
    %55 = vector.broadcast %54 : vector<16x1xf32> to vector<16x128xf32>
    %56 = arith.subf %50, %55 : vector<16x128xf32>
    %57 = arith.mulf %56, %56 : vector<16x128xf32>
    %cst_27 = arith.constant dense<0.000000e+00> : vector<16xf32>
    %58 = vector.multi_reduction <add>, %57, %cst_27 [1] : vector<16x128xf32> to vector<16xf32>
    %59 = vector.shape_cast %58 : vector<16xf32> to vector<16x1xf32>
    %cst_28 = arith.constant 1.280000e+02 : f32
    %60 = vector.broadcast %cst_28 : f32 to vector<16x1xf32>
    %61 = arith.divf %59, %60 : vector<16x1xf32>
    %62 = vector.broadcast %54 : vector<16x1xf32> to vector<16x128xf32>
    %63 = arith.subf %50, %62 : vector<16x128xf32>
    %cst_29 = arith.constant 9.99999974E-6 : f32
    %64 = vector.broadcast %cst_29 : f32 to vector<16x1xf32>
    %65 = arith.addf %61, %64 : vector<16x1xf32>
    %66 = math.rsqrt %65 : vector<16x1xf32>
    %67 = vector.broadcast %66 : vector<16x1xf32> to vector<16x128xf32>
    %68 = arith.mulf %63, %67 : vector<16x128xf32>
    %c0_30 = arith.constant 0 : index
    %c0_31 = arith.constant 0 : index
    %69 = vector.load %arg5[%c0_30, %c0_31] : memref<128x512xf32, #tpu.memory_space<vmem>>, vector<128x512xf32>
    %cst_32 = arith.constant dense<0.000000e+00> : vector<16x512xf32>
    %70 = tpu.matmul %68, %69, %cst_32 {dimension_numbers = #tpu.dot_dimension_numbers<[1], [0], [0], [1], [0, 0, 1, 1], [], []>} : vector<16x128xf32>, vector<128x512xf32>, vector<16x512xf32> -> vector<16x512xf32>
    %c0_33 = arith.constant 0 : index
    %c0_34 = arith.constant 0 : index
    %71 = vector.load %arg6[%c0_33, %c0_34] : memref<1x512xf32, #tpu.memory_space<vmem>>, vector<1x512xf32>
    %72 = vector.broadcast %71 : vector<1x512xf32> to vector<16x512xf32>
    %73 = arith.addf %70, %72 : vector<16x512xf32>
    %cst_35 = arith.constant 5.000000e-01 : f32
    %74 = vector.broadcast %cst_35 : f32 to vector<16x512xf32>
    %75 = arith.mulf %74, %73 : vector<16x512xf32>
    %cst_36 = arith.constant 0.636619746 : f32
    %76 = math.sqrt %cst_36 : f32
    %cst_37 = arith.constant 4.471500e-01 : f32
    %77 = vector.broadcast %cst_37 : f32 to vector<16x512xf32>
    %78 = arith.mulf %77, %73 : vector<16x512xf32>
    %79 = arith.mulf %78, %73 : vector<16x512xf32>
    %80 = arith.mulf %79, %73 : vector<16x512xf32>
    %81 = arith.addf %73, %80 : vector<16x512xf32>
    %82 = vector.broadcast %76 : f32 to vector<16x512xf32>
    %83 = arith.mulf %82, %81 : vector<16x512xf32>
    %84 = math.tanh %83 : vector<16x512xf32>
    %cst_38 = arith.constant 1.000000e+00 : f32
    %85 = vector.broadcast %cst_38 : f32 to vector<16x512xf32>
    %86 = arith.addf %85, %84 : vector<16x512xf32>
    %87 = arith.mulf %75, %86 : vector<16x512xf32>
    %c0_39 = arith.constant 0 : index
    %c0_40 = arith.constant 0 : index
    %88 = vector.load %arg7[%c0_39, %c0_40] : memref<512x128xf32, #tpu.memory_space<vmem>>, vector<512x128xf32>
    %cst_41 = arith.constant dense<0.000000e+00> : vector<16x128xf32>
    %89 = tpu.matmul %87, %88, %cst_41 {dimension_numbers = #tpu.dot_dimension_numbers<[1], [0], [0], [1], [0, 0, 1, 1], [], []>} : vector<16x512xf32>, vector<512x128xf32>, vector<16x128xf32> -> vector<16x128xf32>
    %c0_42 = arith.constant 0 : index
    %c0_43 = arith.constant 0 : index
    %90 = vector.load %arg8[%c0_42, %c0_43] : memref<1x128xf32, #tpu.memory_space<vmem>>, vector<1x128xf32>
    %91 = vector.broadcast %90 : vector<1x128xf32> to vector<16x128xf32>
    %92 = arith.addf %89, %91 : vector<16x128xf32>
    %93 = arith.addf %50, %92 : vector<16x128xf32>
    %c0_44 = arith.constant 0 : index
    %c0_45 = arith.constant 0 : index
    %94 = vector.load %arg12[%c0_44, %c0_45] : memref<16x128xf32, #tpu.memory_space<vmem>>, vector<16x128xf32>
    tpu.vector_store %arg12[%c0_44, %c0_45], %93 {strides = array<i32>} : memref<16x128xf32, #tpu.memory_space<vmem>>, vector<16x128xf32>,
    return
  }
}

</mosaic_0001>

<bundles_post_ra>
// kernel: tpu_custom_call.1
= control target key start
LH: loop header
LB: loop body
LE: loop exit
PB: predicated region body
PF: predicated region fallthrough
CT: control target
= control target key end

     0   :  { %17 = vsyncpa [#allocation3], 0  ;;  %s2537_s0 = inlined_call_operand.hbm [shape: f32[16,128], index: 0, kind: input, shape index: {}]   ;;  %s2538_s1 = inlined_call_operand.hbm [shape: f32[128,384], index: 1, kind: input, shape index: {}]   ;;  %s2539_s2 = inlined_call_operand.vmem [shape: f32[1,384], index: 2, kind: input, shape index: {}]   ;;  %s2540_s3 = inlined_call_operand.hbm [shape: f32[128,128], index: 3, kind: input, shape index: {}]   ;;  %s2541_s4 = inlined_call_operand.vmem [shape: f32[1,128], index: 4, kind: input, shape index: {}]   ;;  %s2542_s5 = inlined_call_operand.hbm [shape: f32[128,512], index: 5, kind: input, shape index: {}]   ;;  %s2543_s6 = inlined_call_operand.vmem [shape: f32[1,512], index: 6, kind: input, shape index: {}]   ;;  %s2544_s7 = inlined_call_operand.hbm [shape: f32[512,128], index: 7, kind: input, shape index: {}]   ;;  %s2545_s8 = inlined_call_operand.vmem [shape: f32[1,128], index: 8, kind: input, shape index: {}]   ;;  %s2546_s9 = inlined_call_operand.hbm [shape: f32[64,128], index: 9, kind: input, shape index: {}]   ;;  %s2547_s10 = inlined_call_operand.hbm [shape: f32[64,64], index: 10, kind: input, shape index: {}]   ;;  %s2548_s11 = inlined_call_operand.vmem [shape: f32[16,64], index: 11, kind: input, shape index: {}]   ;;  %s2549_s12 = inlined_call_operand.hbm [shape: f32[16,128], index: 12, kind: output, shape index: {}]  }
   0x1   :  { %18 = vsyncpa [#allocation6], 0 }
   0x2   :  { %19 = vsyncpa [#allocation9], 0 }
   0x3   :  { %20 = vsyncpa [#allocation12], 0 }
   0x4   :  { %21 = vsyncpa [#allocation4], 0  ;;  %s2142_s21 = smov [#allocation5]   ;;  %s1956_s25 = scalar_lea.hbm %s2538_s1, 6144 }
   0x5   :  { %s39_s22 = sshll.u32 %s2142_s21, 4  ;;  %p1957_p0 = scmp.ne.s32.totalorder %s2538_s1, %s1956_s25  ;;  %s40_s22 = int_to_ptr.vmem [resolvable:$true] %s39_s22 }
   0x6   :  { %p1960_p1 = scmp.lt.u32.totalorder %s1956_s25, %s2538_s1 }
   0x8   :  { %p1962_p2 = pnand %p1960_p1, %p1957_p0 }
   0xa   :  { %1965 = shalt.err (!%p1962_p2)
}
   0xb   :  { %s1966_s30 = scalar_lea.vmem %s40_s22, 6144  ;;  %p1971_p4 = scmp.lt.s32.totalorder %s40_s22, %s40_s22 }
   0xc   :  { %p1967_p3 = scmp.ne.s32.totalorder %s40_s22, %s1966_s30  ;;  %p1972_p5 = scmp.lt.s32.totalorder %s1966_s30, %s1966_s30 }
   0xe   :  { %p1973_p6 = por %p1972_p5, %p1971_p4 }
  0x10   :  { %p1974_p7 = pnand %p1973_p6, %p1967_p3 }
  0x12   :  { %1977 = shalt.err (!%p1974_p7)
}
  0x13   :  { %s2143_s13 = smov 384   ;;  %s2144_s14 = smov 24  }
  0x14   :  { %45 = dma.hbm_to_vmem [thread:$0]  %s2538_s1, 6144, %s40_s22, [#allocation6], %s2143_s13, %s2143_s13, %s2144_s14  }
  0x15   :  { %s2145_s17 = smov [#allocation8]   ;;  %s1978_s21 = scalar_lea.hbm %s2542_s5, 8192 }
  0x16   :  { %s67_s18 = sshll.u32 %s2145_s17, 4  ;;  %p1979_p8 = scmp.ne.s32.totalorder %s2542_s5, %s1978_s21  ;;  %s68_s18 = int_to_ptr.vmem [resolvable:$true] %s67_s18 }
  0x17   :  { %p1982_p9 = scmp.lt.u32.totalorder %s1978_s21, %s2542_s5 }
  0x19   :  { %p1984_p10 = pnand %p1982_p9, %p1979_p8 }
  0x1b   :  { %1987 = shalt.err (!%p1984_p10)
}
  0x1c   :  { %s1988_s27 = scalar_lea.vmem %s68_s18, 8192  ;;  %p1993_p12 = scmp.lt.s32.totalorder %s68_s18, %s68_s18 }
  0x1d   :  { %p1989_p11 = scmp.ne.s32.totalorder %s68_s18, %s1988_s27  ;;  %p1994_p13 = scmp.lt.s32.totalorder %s1988_s27, %s1988_s27 }
  0x1f   :  { %p1995_p0 = por %p1994_p13, %p1993_p12 }
  0x21   :  { %p1996_p1 = pnand %p1995_p0, %p1989_p11 }
  0x23   :  { %1999 = shalt.err (!%p1996_p1)
}
  0x24   :  { %s2146_s1 = smov 512   ;;  %s2147_s22 = smov 32  }
  0x25   :  { %73 = dma.hbm_to_vmem [thread:$0]  %s2542_s5, 8192, %s68_s18, [#allocation9], %s2146_s1, %s2146_s1, %s2147_s22  }
  0x26   :  { %s2148_s30 = smov [#allocation11]   ;;  %s2149_s14 = smov [#allocation2]  }
  0x27   :  { %s95_s13 = sshll.u32 %s2148_s30, 4  ;;  %s27_s15 = sshll.u32 %s2149_s14, 4  ;;  %s96_s13 = int_to_ptr.vmem [resolvable:$true] %s95_s13  ;;  %s2246_s15 = int_to_ptr.vmem [resolvable:$true] %s27_s15 }
  0x28   :  { %s2000_s19 = scalar_lea.hbm %s2546_s9, 1024 }
  0x29   :  { %p2001_p2 = scmp.ne.s32.totalorder %s2546_s9, %s2000_s19  ;;  %p2004_p3 = scmp.lt.u32.totalorder %s2000_s19, %s2546_s9 }
  0x2b   :  { %p2006_p4 = pnand %p2004_p3, %p2001_p2 }
  0x2d   :  { %2009 = shalt.err (!%p2006_p4)
}
  0x2e   :  { %s2010_s5 = scalar_lea.vmem %s96_s13, 1024  ;;  %p2015_p6 = scmp.lt.s32.totalorder %s96_s13, %s96_s13 }
  0x2f   :  { %p2011_p5 = scmp.ne.s32.totalorder %s96_s13, %s2010_s5  ;;  %p2016_p7 = scmp.lt.s32.totalorder %s2010_s5, %s2010_s5 }
  0x31   :  { %p2017_p8 = por %p2016_p7, %p2015_p6 }
  0x33   :  { %p2018_p9 = pnand %p2017_p8, %p2011_p5 }
  0x35   :  { %2021 = shalt.err (!%p2018_p9)
}
  0x36   :  { %s2150_s18 = smov 128   ;;  %s2151_s25 = smov 8  }
  0x37   :  { %101 = dma.hbm_to_vmem [thread:$0]  %s2546_s9, 1024, %s96_s13, [#allocation12], %s2150_s18, %s2150_s18, %s2151_s25  }
  0x38   :  { %s2022_s28 = scalar_lea.hbm %s2537_s0, 256 }
  0x39   :  { %p2023_p10 = scmp.ne.s32.totalorder %s2537_s0, %s2022_s28  ;;  %p2026_p11 = scmp.lt.u32.totalorder %s2022_s28, %s2537_s0 }
  0x3b   :  { %p2028_p12 = pnand %p2026_p11, %p2023_p10 }
  0x3d   :  { %2031 = shalt.err (!%p2028_p12)
}
  0x3e   :  { %s2032_s17 = scalar_lea.vmem %s2246_s15, 256  ;;  %p2037_p0 = scmp.lt.s32.totalorder %s2246_s15, %s2246_s15 }
  0x3f   :  { %p2033_p13 = scmp.ne.s32.totalorder %s2246_s15, %s2032_s17  ;;  %p2038_p1 = scmp.lt.s32.totalorder %s2032_s17, %s2032_s17 }
  0x41   :  { %p2039_p2 = por %p2038_p1, %p2037_p0 }
  0x43   :  { %p2040_p3 = pnand %p2039_p2, %p2033_p13 }
  0x45   :  { %2043 = shalt.err (!%p2040_p3)
}
  0x46   :  { %33 = dma.hbm_to_vmem [thread:$0]  %s2537_s0, 256, %s2246_s15, [#allocation3], %s2150_s18, %s2150_s18, %s2151_s25  }
  0x47   :  { %s2152_s19 = smov [#allocation7]   ;;  %s2153_s21 = smov [#allocation10]  }
  0x48   :  { %s53_s20 = sshll.u32 %s2152_s19, 4  ;;  %s81_s23 = sshll.u32 %s2153_s21, 4  ;;  %s54_s20 = int_to_ptr.vmem [resolvable:$true] %s53_s20  ;;  %s2283_s23 = int_to_ptr.vmem [resolvable:$true] %s81_s23 }
  0x49   :  { %s2044_s26 = scalar_lea.hbm %s2540_s3, 2048 }
  0x4a   :  { %p2045_p4 = scmp.ne.s32.totalorder %s2540_s3, %s2044_s26  ;;  %p2048_p5 = scmp.lt.u32.totalorder %s2044_s26, %s2540_s3 }
  0x4c   :  { %p2050_p6 = pnand %p2048_p5, %p2045_p4 }
  0x4e   :  { %2053 = shalt.err (!%p2050_p6)
}
  0x4f   :  { %s2054_s0 = scalar_lea.vmem %s54_s20, 2048  ;;  %p2059_p8 = scmp.lt.s32.totalorder %s54_s20, %s54_s20 }
  0x50   :  { %p2055_p7 = scmp.ne.s32.totalorder %s54_s20, %s2054_s0  ;;  %p2060_p9 = scmp.lt.s32.totalorder %s2054_s0, %s2054_s0 }
  0x52   :  { %p2061_p10 = por %p2060_p9, %p2059_p8 }
  0x54   :  { %p2062_p11 = pnand %p2061_p10, %p2055_p7 }
  0x56   :  { %2065 = shalt.err (!%p2062_p11)
}
  0x57   :  { %59 = dma.hbm_to_vmem [thread:$0]  %s2540_s3, 2048, %s54_s20, [#allocation6], %s2150_s18, %s2150_s18, %s2151_s25  }
  0x58   :  { %s2066_s16 = scalar_lea.hbm %s2544_s7, 8192 }
  0x59   :  { %p2067_p12 = scmp.ne.s32.totalorder %s2544_s7, %s2066_s16  ;;  %p2070_p13 = scmp.lt.u32.totalorder %s2066_s16, %s2544_s7 }
  0x5b   :  { %p2072_p0 = pnand %p2070_p13, %p2067_p12 }
  0x5d   :  { %2075 = shalt.err (!%p2072_p0)
}
  0x5e   :  { %s2076_s21 = scalar_lea.vmem %s2283_s23, 8192  ;;  %p2081_p2 = scmp.lt.s32.totalorder %s2283_s23, %s2283_s23 }
  0x5f   :  { %p2077_p1 = scmp.ne.s32.totalorder %s2283_s23, %s2076_s21  ;;  %p2082_p3 = scmp.lt.s32.totalorder %s2076_s21, %s2076_s21 }
  0x61   :  { %p2083_p4 = por %p2082_p3, %p2081_p2 }
  0x63   :  { %p2084_p5 = pnand %p2083_p4, %p2077_p1 }
  0x65   :  { %2087 = shalt.err (!%p2084_p5)
}
  0x66   :  { %87 = dma.hbm_to_vmem [thread:$0]  %s2544_s7, 8192, %s2283_s23, [#allocation9], %s2150_s18, %s2150_s18, %s2151_s25  }
  0x67   :  { %s2154_s24 = smov [#allocation13]   ;;  %s2088_s1 = scalar_lea.hbm %s2547_s10, 1024 }
  0x68   :  { %s107_s5 = sshll.u32 %s2154_s24, 4  ;;  %p2089_p6 = scmp.ne.s32.totalorder %s2547_s10, %s2088_s1  ;;  %s108_s5 = int_to_ptr.vmem [resolvable:$true] %s107_s5 }
  0x69   :  { %p2092_p7 = scmp.lt.u32.totalorder %s2088_s1, %s2547_s10 }
  0x6b   :  { %p2094_p8 = pnand %p2092_p7, %p2089_p6 }
  0x6d   :  { %2097 = shalt.err (!%p2094_p8)
}
  0x6e   :  { %s2098_s29 = scalar_lea.vmem %s108_s5, 1024  ;;  %p2103_p10 = scmp.lt.s32.totalorder %s108_s5, %s108_s5 }
  0x6f   :  { %p2099_p9 = scmp.ne.s32.totalorder %s108_s5, %s2098_s29  ;;  %p2104_p11 = scmp.lt.s32.totalorder %s2098_s29, %s2098_s29 }
  0x71   :  { %p2105_p12 = por %p2104_p11, %p2103_p10 }
  0x73   :  { %p2106_p13 = pnand %p2105_p12, %p2099_p9 }
  0x75   :  { %2109 = shalt.err (!%p2106_p13)
}
  0x76   :  { %113 = dma.hbm_to_vmem [thread:$0]  %s2547_s10, 1024, %s108_s5, [#allocation12], %s2150_s18, %s2150_s18, %s2151_s25  }
  0x77   :  { %2132 = dma.done.wait [#allocation3], 256  }
  0x78   :  { %2133 = vsyncadd [#allocation3], 4294967040 }
  0x79   :  { %2134 = dma.done.wait [#allocation6], 8192  }
  0x7a   :  { %2135 = vsyncadd [#allocation6], 4294959104 }
  0x7b   :  { %2136 = dma.done.wait [#allocation9], 16384  }
  0x7c   :  { %2137 = vsyncadd [#allocation9], 4294950912 }
  0x7d   :  { %2138 = dma.done.wait [#allocation12], 2048  }
  0x7e   :  { %2139 = vsyncadd [#allocation12], 4294965248  ;;  %v2335_v0 = vld [vmem:[#allocation2] sm:$0xff]  ;;  %v2338_v1 = vld [vmem:[#allocation2 + $0x8] sm:$0xff]  ;;  %vm480_vm0 = vcmask 523264   ;;  %s2156_s21 = smov [#allocation14]  }
  0x7f   :  { %139 = vadd.xlane.f32.xlu0 %v2335_v0  ;;  %v163_v2 = vld [vmem:[#allocation5 + $0x8] sm:$0xff]  ;;  %v166_v3 = vld [vmem:[#allocation5 + $0x20] sm:$0xff]  ;;  %v165_v6 = vld [vmem:[#allocation5 + $0x18] sm:$0xff]  ;;  %s1331_s3 = sshll.u32 %s2156_s21, 4  ;;  %s1332_s3 = int_to_ptr.vmem [resolvable:$true] %s1331_s3 }
  0x80   :  { %v162_v4 = vld [vmem:[#allocation5] sm:$0xff]  ;;  %v1621_v5 = vpack.c.bf16 %v166_v3, %v163_v2  ;;  %v169_v7 = vld [vmem:[#allocation5 + $0x38] sm:$0xff]  ;;  %v172_v8 = vld [vmem:[#allocation5 + $0x50] sm:$0xff]  ;;  %p2115_p1 = scmp.lt.s32.totalorder %s1332_s3, %s1332_s3 }
  0x81   :  { %v1623_v9 = vpack.c.bf16 %v165_v6, %v162_v4  ;;  %v1625_v10 = vpack.c.bf16 %v172_v8, %v169_v7  ;;  %v164_v11 = vld [vmem:[#allocation5 + $0x10] sm:$0xff]  ;;  %v167_v12 = vld [vmem:[#allocation5 + $0x28] sm:$0xff]  ;;  %v178_v17 = vld [vmem:[#allocation5 + $0x80] sm:$0xff] }
  0x82   :  { %v168_v13 = vld [vmem:[#allocation5 + $0x30] sm:$0xff]  ;;  %1622 = vmatprep.subr.bf16.mxu0 %v1621_v5  ;;  %v1653_v14 = vpack.c.bf16 %v167_v12, %v164_v11  ;;  %v171_v15 = vld [vmem:[#allocation5 + $0x48] sm:$0xff]  ;;  %v170_v19 = vld [vmem:[#allocation5 + $0x40] sm:$0xff] }
  0x83   :  { %141 = vadd.xlane.f32.xlu0 %v2338_v1  ;;  %v175_v16 = vld [vmem:[#allocation5 + $0x68] sm:$0xff]  ;;  %1624 = vmatpush1.bf16.msra.mxu0 %v1623_v9  ;;  %v1627_v18 = vpack.c.bf16 %v171_v15, %v168_v13  ;;  %v173_v20 = vld [vmem:[#allocation5 + $0x58] sm:$0xff]  ;;  %v174_v23 = vld [vmem:[#allocation5 + $0x60] sm:$0xff]  ;;  %v2155_v15 = vmov 0.0  }
  0x84   :  { %1626 = vmatprep.subr.bf16.mxu0 %v1625_v10  ;;  %1654 = vmatprep.subr.bf16.mxu1 %v1653_v14  ;;  %v1629_v21 = vpack.c.bf16 %v178_v17, %v175_v16  ;;  %v1657_v22 = vpack.c.bf16 %v173_v20, %v170_v19  ;;  %v177_v24 = vld [vmem:[#allocation5 + $0x78] sm:$0xff]  ;;  %v184_v26 = vld [vmem:[#allocation5 + $0xb0] sm:$0xff]  ;;  %v179_v28 = vld [vmem:[#allocation5 + $0x88] sm:$0xff] }
  0x85   :  { %v181_v25 = vld [vmem:[#allocation5 + $0x98] sm:$0xff]  ;;  %1656 = vmatpush3.bf16.msra.mxu1 %v1653_v14  ;;  %v176_v27 = vld [vmem:[#allocation5 + $0x70] sm:$0xff]  ;;  %v1631_v30 = vpack.c.bf16 %v177_v24, %v174_v23  ;;  %v183_v33 = vld [vmem:[#allocation5 + $0xa8] sm:$0xff]  ;;  %291 = vmatprep.mubr.f32.mxu0 %v2155_v15 }
  0x86   :  { %1658 = vmatprep.subr.bf16.mxu1 %v1657_v22  ;;  %v1661_v29 = vpack.c.bf16 %v179_v28, %v176_v27  ;;  %v1633_v31 = vpack.c.bf16 %v184_v26, %v181_v25  ;;  %v180_v32 = vld [vmem:[#allocation5 + $0x90] sm:$0xff]  ;;  %v187_v43 = vld [vmem:[#allocation5 + $0xc8] sm:$0xff]  ;;  %v190_v44 = vld [vmem:[#allocation5 + $0xe0] sm:$0xff] }
  0x87   :  { %1628 = vmatpush1.bf16.msra.mxu0 %v1627_v18  ;;  %v1635_v34 = vpack.c.bf16 %v183_v33, %v180_v32  ;;  %v182_v45 = vld [vmem:[#allocation5 + $0xa0] sm:$0xff]  ;;  %v1637_v46 = vpack.c.bf16 %v190_v44, %v187_v43  ;;  %v185_v47 = vld [vmem:[#allocation5 + $0xb8] sm:$0xff]  ;;  %v196_v53 = vld [vmem:[#allocation5 + $0x110] sm:$0xff]  ;;  %v212_v44 = vlaneseq }
  0x88   :  { %1630 = vmatprep.subr.bf16.mxu0 %v1629_v21  ;;  %v186_v48 = vld [vmem:[#allocation5 + $0xc0] sm:$0xff]  ;;  %v189_v49 = vld [vmem:[#allocation5 + $0xd8] sm:$0xff]  ;;  %v1665_v50 = vpack.c.bf16 %v185_v47, %v182_v45  ;;  %v188_v54 = vld [vmem:[#allocation5 + $0xd0] sm:$0xff] }
  0x89   :  { %1660 = vmatpush3.bf16.msra.mxu1 %v1657_v22  ;;  %v1639_v51 = vpack.c.bf16 %v189_v49, %v186_v48  ;;  %v193_v52 = vld [vmem:[#allocation5 + $0xf8] sm:$0xff]  ;;  %v191_v56 = vld [vmem:[#allocation5 + $0xe8] sm:$0xff]  ;;  %v192_v57 = vld [vmem:[#allocation5 + $0xf0] sm:$0xff] }
  0x8a   :  { %1662 = vmatprep.subr.bf16.mxu1 %v1661_v29  ;;  %v1641_v55 = vpack.c.bf16 %v196_v53, %v193_v52  ;;  %v195_v58 = vld [vmem:[#allocation5 + $0x108] sm:$0xff]  ;;  %v1669_v59 = vpack.c.bf16 %v191_v56, %v188_v54  ;;  %v202_v62 = vld [vmem:[#allocation5 + $0x140] sm:$0xff]  ;;  %v197_v3 = vld [vmem:[#allocation5 + $0x118] sm:$0xff] }
  0x8b   :  { %1632 = vmatpush1.bf16.msra.mxu0 %v1631_v30  ;;  %v1643_v60 = vpack.c.bf16 %v195_v58, %v192_v57  ;;  %v199_v61 = vld [vmem:[#allocation5 + $0x128] sm:$0xff]  ;;  %v194_v63 = vld [vmem:[#allocation5 + $0x100] sm:$0xff]  ;;  %v201_v5 = vld [vmem:[#allocation5 + $0x138] sm:$0xff] }
  0x8c   :  { %1634 = vmatprep.subr.bf16.mxu0 %v1633_v31  ;;  %v1645_v2 = vpack.c.bf16 %v202_v62, %v199_v61  ;;  %v198_v4 = vld [vmem:[#allocation5 + $0x120] sm:$0xff]  ;;  %v1673_v6 = vpack.c.bf16 %v197_v3, %v194_v63  ;;  %v205_v8 = vld [vmem:[#allocation5 + $0x158] sm:$0xff]  ;;  %v208_v9 = vld [vmem:[#allocation5 + $0x170] sm:$0xff] }
  0x8d   :  { %1664 = vmatpush3.bf16.msra.mxu1 %v1661_v29  ;;  %v1647_v7 = vpack.c.bf16 %v201_v5, %v198_v4  ;;  %v200_v10 = vld [vmem:[#allocation5 + $0x130] sm:$0xff]  ;;  %v1649_v11 = vpack.c.bf16 %v208_v9, %v205_v8  ;;  %v203_v12 = vld [vmem:[#allocation5 + $0x148] sm:$0xff]  ;;  %v206_v18 = vld [vmem:[#allocation5 + $0x160] sm:$0xff] }
  0x8e   :  { %1666 = vmatprep.subr.bf16.mxu1 %v1665_v50  ;;  %v204_v13 = vld [vmem:[#allocation5 + $0x150] sm:$0xff]  ;;  %v207_v14 = vld [vmem:[#allocation5 + $0x168] sm:$0xff]  ;;  %v1677_v16 = vpack.c.bf16 %v203_v12, %v200_v10  ;;  %v209_v19 = vld [vmem:[#allocation5 + $0x178] sm:$0xff] }
  0x8f   :  { %1636 = vmatpush1.bf16.msra.mxu0 %v1635_v34  ;;  %v1651_v17 = vpack.c.bf16 %v207_v14, %v204_v13  ;;  %v1681_v20 = vpack.c.bf16 %v209_v19, %v206_v18  ;;  %v493_v21 = vld [vmem:[#allocation13] sm:$0xff]  ;;  %v494_v22 = vld [vmem:[#allocation13 + $0x8] sm:$0xff]  ;;  %v495_v34 = vld [vmem:[#allocation13 + $0x10] sm:$0xff] }
  0x90   :  { %1638 = vmatprep.subr.bf16.mxu0 %v1637_v46  ;;  %v1701_v23 = vpack.c.bf16 %v494_v22, %v493_v21  ;;  %v210_v46 = vld [vmem:[%s2539_s2] sm:$0x7]  ;;  %v379_v56 = vld [vmem:[#allocation11] sm:$0xff]  ;;  %v380_v58 = vld [vmem:[#allocation11 + $0x8] sm:$0xff] }
  0x91   :  { %1668 = vmatpush3.bf16.msra.mxu1 %v1665_v50  ;;  %v381_v57 = vld [vmem:[#allocation11 + $0x10] sm:$0xff]  ;;  %v382_v63 = vld [vmem:[#allocation11 + $0x18] sm:$0xff] }
  0x92   :  { %1670 = vmatprep.subr.bf16.mxu1 %v1669_v59  ;;  %v386_v3 = vld [vmem:[#allocation11 + $0x38] sm:$0xff] }
  0x93   :  { %1640 = vmatpush1.bf16.msra.mxu0 %v1639_v51 }
  0x94   :  { %1642 = vmatprep.subr.bf16.mxu0 %v1641_v55 }
  0x95   :  { %1672 = vmatpush3.bf16.msra.mxu1 %v1669_v59  ;;  %v383_v59 = vld [vmem:[#allocation11 + $0x20] sm:$0xff] }
  0x96   :  { %1674 = vmatprep.subr.bf16.mxu1 %v1673_v6 }
  0x97   :  { %1644 = vmatpush1.bf16.msra.mxu0 %v1643_v60  ;;  %v385_v60 = vld [vmem:[#allocation11 + $0x30] sm:$0xff] }
  0x98   :  { %1646 = vmatprep.subr.bf16.mxu0 %v1645_v2  ;;  %v384_v2 = vld [vmem:[#allocation11 + $0x28] sm:$0xff] }
  0x99   :  { %1676 = vmatpush3.bf16.msra.mxu1 %v1673_v6 }
  0x9a   :  { %1678 = vmatprep.subr.bf16.mxu1 %v1677_v16 }
  0x9b   :  { %1648 = vmatpush1.bf16.msra.mxu0 %v1647_v7 }
  0x9c   :  { %1650 = vmatprep.subr.bf16.mxu0 %v1649_v11 }
  0x9d   :  { %1680 = vmatpush3.bf16.msra.mxu1 %v1677_v16 }
  0x9e   :  { %1682 = vmatprep.subr.bf16.mxu1 %v1681_v20 }
  0x9f   :  { %1652 = vmatpush1.bf16.msra.mxu0 %v1651_v17 }
  0xa1   :  { %1684 = vmatpush3.bf16.msra.mxu1 %v1681_v20 }
  0xa2   :  { %1702 = vmatprep.subr.bf16.mxu1 %v1701_v23 }
 0x10c   :  { %v140_v35 = vpop.xlane.xlu0 %139 }
 0x10d   :  { %v144_v36 = vmul.f32 0.0078125, %v140_v35  ;;  %v496_v35 = vld [vmem:[#allocation13 + $0x18] sm:$0xff] }
 0x10f   :  { %v2342_v37 = vsub.f32 %v2335_v0, %v144_v36  ;;  %v1705_v36 = vpack.c.bf16 %v496_v35, %v495_v34  ;;  %v404_v35 = vld [vmem:[%s2548_s11 + $0x8] sm:$0xff] }
 0x110   :  { %v142_v38 = vpop.xlane.xlu0 %141 }
 0x111   :  { %v145_v39 = vmul.f32 0.0078125, %v142_v38  ;;  %v148_v40 = vmul.f32 %v2342_v37, %v2342_v37  ;;  %v497_v38 = vld [vmem:[#allocation13 + $0x20] sm:$0xff] }
 0x113   :  { %v2347_v41 = vsub.f32 %v2338_v1, %v145_v39  ;;  %150 = vadd.xlane.f32.xlu1 %v148_v40  ;;  %v498_v39 = vld [vmem:[#allocation13 + $0x28] sm:$0xff] }
 0x114   :  { %v1709_v40 = vpack.c.bf16 %v498_v39, %v497_v38 }
 0x115   :  { %v149_v42 = vmul.f32 %v2347_v41, %v2347_v41 }
 0x117   :  { %152 = vadd.xlane.f32.xlu1 %v149_v42  ;;  %v500_v42 = vld [vmem:[#allocation13 + $0x38] sm:$0xff] }
 0x1a0   :  { %v151_v24 = vpop.xlane.xlu1 %150 }
 0x1a1   :  { %v154_v25 = vmul.f32 0.0078125, %v151_v24 }
 0x1a3   :  { %v156_v26 = vadd.f32 1e-05, %v154_v25 }
 0x1a4   :  { %v153_v27 = vpop.xlane.xlu1 %152 }
 0x1a5   :  { %1924 = vrsqrt.f32 %v156_v26  ;;  %v155_v28 = vmul.f32 0.0078125, %v153_v27 }
 0x1a7   :  { %v157_v29 = vadd.f32 1e-05, %v155_v28 }
 0x1a9   :  { %1926 = vrsqrt.f32 %v157_v29 }
 0x1af   :  { %v1925_v30 = vpop.eup %1924 }
 0x1b0   :  { %v160_v31 = vmul.f32 %v1925_v30, %v2342_v37  ;;  %v499_v37 = vld [vmem:[#allocation13 + $0x30] sm:$0xff] }
 0x1b1   :  { %v1713_v43 = vpack.c.bf16 %v500_v42, %v499_v37 }
 0x1b2   :  { %292 = vmatmul.mubr.f32.vlgmr.msra.gmra.mrb[0].mxu0 %v160_v31  ;;  %1526 = vmatprep.mubr.f32.mxu1 %v160_v31 }
 0x1b3   :  { %v1927_v32 = vpop.eup %1926  ;;  %297 = vmatprep.mubr.f32.mxu0 %v2155_v15 }
 0x1b4   :  { %v161_v33 = vmul.f32 %v1927_v32, %v2347_v41  ;;  %v2355_v41 = vshrl.u32 %v212_v44, 7 }
 0x1b6   :  { %298 = vmatmul.mubr.f32.gmra.mrb[2].mxu0 %v161_v33  ;;  %1527 = vmatmul.mubr.f32.vlgmr.msra.gmra.mrb[0].mxu1 %v161_v33  ;;  %v214_v45 = vsub.s32 0, %v2355_v41  ;;  %v218_v47 = vsub.s32 1, %v2355_v41  ;;  %v222_v49 = vsub.s32 2, %v2355_v41 }
 0x1b7   :  { %1704 = vmatpush3.bf16.msra.mxu1 %v1701_v23 }
 0x1b8   :  { %1706 = vmatprep.subr.bf16.mxu1 %v1705_v36  ;;  %v215_v48 = vrot.slane %v210_v46, %v214_v45  ;;  %v219_v50 = vrot.slane %v210_v46, %v218_v47  ;;  %v223_v54 = vrot.slane %v210_v46, %v222_v49 }
 0x1bb   :  { %1708 = vmatpush3.bf16.msra.mxu1 %v1705_v36  ;;  %v403_v36 = vld [vmem:[%s2548_s11] sm:$0xff] }
 0x1bc   :  { %1710 = vmatprep.subr.bf16.mxu1 %v1709_v40 }
 0x1bf   :  { %1712 = vmatpush3.bf16.msra.mxu1 %v1709_v40 }
 0x1c0   :  { %1714 = vmatprep.subr.bf16.mxu1 %v1713_v43 }
 0x1c3   :  { %1716 = vmatpush3.bf16.msra.mxu1 %v1713_v43 }
 0x285   :  { %v293_v51 = vpop.f32.mrb[0].mxu0 }
 0x286   :  { %v294_v52 = vadd.f32 %v293_v51, %v215_v48  ;;  %v295_v53 = vpop.f32.mrb[1].mxu0 }
 0x287   :  { %v296_v55 = vadd.f32 %v295_v53, %v219_v50 }
 0x288   :  { %1545 = vmatprep.mubr.f32.mxu0 %v294_v52 }
 0x289   :  { %v299_v61 = vpop.f32.mrb[2].mxu0  ;;  %v1528_v62 = vpop.f32.mrb[0].mxu1  ;;  %v387_v7 = vmul.f32 %v379_v56, %v296_v55  ;;  %v389_v8 = vmul.f32 %v381_v57, %v296_v55  ;;  %v391_v11 = vmul.f32 %v383_v59, %v296_v55  ;;  %v393_v12 = vmul.f32 %v385_v60, %v296_v55  ;;  %v667_v55 = vld [vmem:[#allocation7] sm:$0xff] }
 0x28a   :  { %v376_v4 = vadd.f32 %v1528_v62, %v223_v54  ;;  %v301_v5 = vpop.f32.mrb[3].mxu0  ;;  %v370_v6 = vpop.f32.mrb[1].mxu1  ;;  %v300_v34 = vadd.f32 %v299_v61, %v215_v48  ;;  %v671_v61 = vld [vmem:[#allocation7 + $0x20] sm:$0xff]  ;;  %v672_v62 = vld [vmem:[#allocation7 + $0x28] sm:$0xff] }
 0x28b   :  { %v302_v9 = vadd.f32 %v301_v5, %v219_v50  ;;  %v371_v10 = vadd.f32 %v370_v6, %v223_v54  ;;  %v675_v5 = vld [vmem:[#allocation7 + $0x40] sm:$0xff]  ;;  %v676_v6 = vld [vmem:[#allocation7 + $0x48] sm:$0xff] }
 0x28c   :  { %v396_v13 = vmul.f32 %v380_v58, %v376_v4  ;;  %v398_v14 = vmul.f32 %v382_v63, %v376_v4  ;;  %v400_v16 = vmul.f32 %v384_v2, %v376_v4  ;;  %v402_v17 = vmul.f32 %v386_v3, %v376_v4 }
 0x28d   :  { %v388_v18 = vmul.f32 %v380_v58, %v302_v9  ;;  %v395_v19 = vmul.f32 %v379_v56, %v371_v10  ;;  %v390_v20 = vmul.f32 %v382_v63, %v302_v9  ;;  %v392_v21 = vmul.f32 %v384_v2, %v302_v9  ;;  %v668_v56 = vld [vmem:[#allocation7 + $0x8] sm:$0xff]  ;;  %v673_v2 = vld [vmem:[#allocation7 + $0x30] sm:$0xff] }
 0x28e   :  { %v394_v22 = vmul.f32 %v386_v3, %v302_v9  ;;  %v397_v23 = vmul.f32 %v381_v57, %v371_v10  ;;  %v399_v24 = vmul.f32 %v383_v59, %v371_v10  ;;  %v401_v25 = vmul.f32 %v385_v60, %v371_v10  ;;  %v669_v57 = vld [vmem:[#allocation7 + $0x10] sm:$0xff]  ;;  %v670_v59 = vld [vmem:[#allocation7 + $0x18] sm:$0xff] }
 0x28f   :  { %v1685_v26 = vpack.c.bf16 %v388_v18, %v387_v7  ;;  %v1717_v27 = vpack.c.bf16 %v396_v13, %v395_v19  ;;  %v1689_v28 = vpack.c.bf16 %v390_v20, %v389_v8  ;;  %v1693_v29 = vpack.c.bf16 %v392_v21, %v391_v11  ;;  %v674_v3 = vld [vmem:[#allocation7 + $0x38] sm:$0xff]  ;;  %v677_v8 = vld [vmem:[#allocation7 + $0x50] sm:$0xff]  ;;  %v679_v11 = vld [vmem:[#allocation7 + $0x60] sm:$0xff] }
 0x290   :  { %v1697_v30 = vpack.c.bf16 %v394_v22, %v393_v12  ;;  %v1721_v31 = vpack.c.bf16 %v398_v14, %v397_v23  ;;  %v1725_v32 = vpack.c.bf16 %v400_v16, %v399_v24  ;;  %v1729_v33 = vpack.c.bf16 %v402_v17, %v401_v25  ;;  %v678_v9 = vld [vmem:[#allocation7 + $0x58] sm:$0xff]  ;;  %v680_v12 = vld [vmem:[#allocation7 + $0x68] sm:$0xff]  ;;  %v681_v14 = vld [vmem:[#allocation7 + $0x70] sm:$0xff] }
 0x291   :  { %1686 = vmatprep.subr.bf16.mxu0 %v1685_v26  ;;  %1718 = vmatprep.subr.bf16.mxu1 %v1717_v27  ;;  %v1733_v58 = vpack.c.bf16 %v668_v56, %v667_v55  ;;  %v1737_v60 = vpack.c.bf16 %v670_v59, %v669_v57  ;;  %v1741_v63 = vpack.c.bf16 %v672_v62, %v671_v61  ;;  %v682_v16 = vld [vmem:[#allocation7 + $0x78] sm:$0xff]  ;;  %v799_v55 = vld [vmem:[#allocation8 + $0x50] sm:$0xff]  ;;  %v810_v59 = vld [vmem:[#allocation8 + $0xa8] sm:$0xff] }
 0x292   :  { %1688 = vmatpush3.bf16.xpose.msra.mxu0 %v1685_v26  ;;  %v1745_v4 = vpack.c.bf16 %v674_v3, %v673_v2  ;;  %v1749_v7 = vpack.c.bf16 %v676_v6, %v675_v5  ;;  %v1753_v10 = vpack.c.bf16 %v678_v9, %v677_v8  ;;  %v1757_v13 = vpack.c.bf16 %v680_v12, %v679_v11  ;;  %v1350_v26 = vld [vmem:[%s2541_s4] ss:$0 sm:$0xff]  ;;  %v808_v62 = vld [vmem:[#allocation8 + $0x98] sm:$0xff]  ;;  %v805_v2 = vld [vmem:[#allocation8 + $0x80] sm:$0xff] }
 0x293   :  { %1690 = vmatprep.subr.bf16.mxu0 %v1689_v28  ;;  %v1761_v17 = vpack.c.bf16 %v682_v16, %v681_v14  ;;  %v803_v57 = vld [vmem:[#allocation8 + $0x70] sm:$0xff]  ;;  %v814_v8 = vld [vmem:[#allocation8 + $0xc8] sm:$0xff]  ;;  %v813_v14 = vld [vmem:[#allocation8 + $0xc0] sm:$0xff] }
 0x294   :  { %v807_v5 = vld [vmem:[#allocation8 + $0x90] sm:$0xff]  ;;  %v818_v9 = vld [vmem:[#allocation8 + $0xe8] sm:$0xff]  ;;  %v817_v16 = vld [vmem:[#allocation8 + $0xe0] sm:$0xff] }
 0x295   :  { %v811_v6 = vld [vmem:[#allocation8 + $0xb0] sm:$0xff]  ;;  %v1777_v12 = vpack.c.bf16 %v818_v9, %v814_v8  ;;  %v850_v8 = vld [vmem:[#allocation8 + $0x1e8] sm:$0xff] }
 0x296   :  { %v1807_v11 = vpack.c.bf16 %v811_v6, %v807_v5  ;;  %v843_v6 = vld [vmem:[#allocation8 + $0x1b0] sm:$0xff] }
 0x29a   :  { %1692 = vmatpush3.bf16.xpose.msra.mxu0 %v1689_v28 }
 0x29b   :  { %1694 = vmatprep.subr.bf16.mxu0 %v1693_v29 }
 0x2a2   :  { %1696 = vmatpush3.bf16.xpose.msra.mxu0 %v1693_v29 }
 0x2a3   :  { %1698 = vmatprep.subr.bf16.mxu0 %v1697_v30 }
 0x2aa   :  { %1700 = vmatpush3.bf16.xpose.msra.mxu0 %v1697_v30 }
 0x2ab   :  { %1734 = vmatprep.subr.bf16.mxu0 %v1733_v58 }
 0x2b1   :  { %1546 = vmatmul.mubr.f32.vlgmr.msra.gmra.mrb[4].mxu0 %v300_v34  ;;  %v794_v34 = vld [vmem:[#allocation8 + $0x28] sm:$0xff] }
 0x2b2   :  { %1736 = vmatpush3.bf16.msra.mxu0 %v1733_v58  ;;  %v806_v58 = vld [vmem:[#allocation8 + $0x88] sm:$0xff] }
 0x2b3   :  { %1738 = vmatprep.subr.bf16.mxu0 %v1737_v60  ;;  %v1773_v61 = vpack.c.bf16 %v810_v59, %v806_v58  ;;  %v842_v59 = vld [vmem:[#allocation8 + $0x1a8] sm:$0xff] }
 0x2b6   :  { %1740 = vmatpush3.bf16.msra.mxu0 %v1737_v60  ;;  %v1803_v60 = vpack.c.bf16 %v803_v57, %v799_v55  ;;  %v831_v55 = vld [vmem:[#allocation8 + $0x150] sm:$0xff]  ;;  %v838_v57 = vld [vmem:[#allocation8 + $0x188] sm:$0xff] }
 0x2b7   :  { %1742 = vmatprep.subr.bf16.mxu0 %v1741_v63 }
 0x2ba   :  { %1744 = vmatpush3.bf16.msra.mxu0 %v1741_v63  ;;  %v812_v63 = vld [vmem:[#allocation8 + $0xb8] sm:$0xff] }
 0x2bb   :  { %1746 = vmatprep.subr.bf16.mxu0 %v1745_v4  ;;  %v1805_v3 = vpack.c.bf16 %v812_v63, %v808_v62  ;;  %v1789_v62 = vpack.c.bf16 %v842_v59, %v838_v57  ;;  %v1136_v57 = vld [vmem:[#allocation10 + $0x118] sm:$0xff]  ;;  %v1122_v59 = vld [vmem:[#allocation10 + $0xa8] sm:$0xff] }
 0x2be   :  { %1748 = vmatpush3.bf16.msra.mxu0 %v1745_v4  ;;  %v809_v4 = vld [vmem:[#allocation8 + $0xa0] sm:$0xff] }
 0x2bf   :  { %1750 = vmatprep.subr.bf16.mxu0 %v1749_v7 }
 0x2c2   :  { %1752 = vmatpush3.bf16.msra.mxu0 %v1749_v7  ;;  %v1775_v7 = vpack.c.bf16 %v809_v4, %v805_v2  ;;  %v837_v2 = vld [vmem:[#allocation8 + $0x180] sm:$0xff]  ;;  %v839_v4 = vld [vmem:[#allocation8 + $0x190] sm:$0xff] }
 0x2c3   :  { %1754 = vmatprep.subr.bf16.mxu0 %v1753_v10  ;;  %v1823_v9 = vpack.c.bf16 %v843_v6, %v839_v4  ;;  %v1137_v4 = vld [vmem:[#allocation10 + $0x120] sm:$0xff] }
 0x2c6   :  { %1756 = vmatpush3.bf16.msra.mxu0 %v1753_v10  ;;  %v816_v10 = vld [vmem:[#allocation8 + $0xd8] sm:$0xff] }
 0x2c7   :  { %1758 = vmatprep.subr.bf16.mxu0 %v1757_v13 }
 0x2ca   :  { %1760 = vmatpush3.bf16.msra.mxu0 %v1757_v13  ;;  %v820_v13 = vld [vmem:[#allocation8 + $0xf8] sm:$0xff] }
 0x2cb   :  { %1762 = vmatprep.subr.bf16.mxu0 %v1761_v17 }
 0x2ce   :  { %1764 = vmatpush3.bf16.msra.mxu0 %v1761_v17  ;;  %v1809_v17 = vpack.c.bf16 %v820_v13, %v816_v10  ;;  %v845_v13 = vld [vmem:[#allocation8 + $0x1c0] sm:$0xff] }
 0x384   :  { %v1547_v38 = vpop.f32.mrb[4].mxu0 }
 0x385   :  { %v477_v39 = vadd.f32 %v1547_v38, %v404_v35  ;;  %v471_v40 = vpop.f32.mrb[5].mxu0  ;;  %v792_v35 = vld [vmem:[#allocation8 + $0x18] sm:$0xff] }
 0x386   :  { %v472_v37 = vadd.f32 %v471_v40, %v403_v36  ;;  %v796_v38 = vld [vmem:[#allocation8 + $0x38] sm:$0xff]  ;;  %v793_v40 = vld [vmem:[#allocation8 + $0x20] sm:$0xff] }
 0x387   :  { %v484_v42 = vsel %vm480_vm0, %v477_v39, -inf }
 0x388   :  { %485 = vmax.xlane.f32.xlu1 %v484_v42  ;;  %v481_v43 = vsel %vm480_vm0, %v472_v37, -inf }
 0x389   :  { %482 = vmax.xlane.f32.xlu0 %v481_v43  ;;  %v791_v43 = vld [vmem:[#allocation8 + $0x10] sm:$0xff] }
 0x415   :  { %v486_v44 = vpop.xlane.xlu1 %485 }
 0x416   :  { %v488_v46 = vsub.f32 %v477_v39, %v486_v44  ;;  %v483_v48 = vpop.xlane.xlu0 %482  ;;  %v789_v39 = vld [vmem:[#allocation8] sm:$0xff]  ;;  %v795_v44 = vld [vmem:[#allocation8 + $0x30] sm:$0xff] }
 0x417   :  { %v487_v50 = vsub.f32 %v472_v37, %v483_v48  ;;  %v1797_v37 = vpack.c.bf16 %v796_v38, %v792_v35  ;;  %v1767_v42 = vpack.c.bf16 %v793_v40, %v789_v39  ;;  %v800_v48 = vld [vmem:[#allocation8 + $0x58] sm:$0xff]  ;;  %v821_v38 = vld [vmem:[#allocation8 + $0x100] sm:$0xff] }
 0x418   :  { %v491_v51 = vmul.f32 1.442695, %v488_v46  ;;  %v1799_v46 = vpack.c.bf16 %v795_v44, %v791_v43  ;;  %v825_v39 = vld [vmem:[#allocation8 + $0x120] sm:$0xff]  ;;  %v827_v43 = vld [vmem:[#allocation8 + $0x130] sm:$0xff] }
 0x419   :  { %v489_v52 = vmul.f32 1.442695, %v487_v50  ;;  %v804_v50 = vld [vmem:[#allocation8 + $0x78] sm:$0xff]  ;;  %1798 = vmatprep.subr.bf16.mxu0 %v1797_v37  ;;  %v1783_v37 = vpack.c.bf16 %v825_v39, %v821_v38  ;;  %v1101_v38 = vld [vmem:[#allocation10] sm:$0xff]  ;;  %v1102_v39 = vld [vmem:[#allocation10 + $0x8] sm:$0xff] }
 0x41b   :  { %1928 = vpow2.f32 %v489_v52  ;;  %v1801_v52 = vpack.c.bf16 %v804_v50, %v800_v48  ;;  %v836_v50 = vld [vmem:[#allocation8 + $0x178] sm:$0xff] }
 0x41c   :  { %1930 = vpow2.f32 %v491_v51 }
 0x425   :  { %v1929_v53 = vpop.eup %1928 }
 0x426   :  { %v1931_v54 = vpop.eup %1930  ;;  %1564 = vmatprep.mubr.msk.f32.mxu1 %vm480_vm0, %v1929_v53 }
 0x427   :  { %1565 = vmatmul.mubr.msk.f32.vlgmr.msra.gmra.mrb[2].mxu1 %vm480_vm0, %v1931_v54 }
 0x428   :  { %1720 = vmatpush3.bf16.msra.mxu1 %v1717_v27 }
 0x429   :  { %1722 = vmatprep.subr.bf16.mxu1 %v1721_v31 }
 0x42c   :  { %1724 = vmatpush3.bf16.msra.mxu1 %v1721_v31 }
 0x42d   :  { %1726 = vmatprep.subr.bf16.mxu1 %v1725_v32 }
 0x430   :  { %1728 = vmatpush3.bf16.msra.mxu1 %v1725_v32 }
 0x431   :  { %1730 = vmatprep.subr.bf16.mxu1 %v1729_v33 }
 0x434   :  { %1732 = vmatpush3.bf16.msra.mxu1 %v1729_v33  ;;  %v790_v33 = vld [vmem:[#allocation8 + $0x8] sm:$0xff] }
 0x435   :  { %v1765_v36 = vpack.c.bf16 %v794_v34, %v790_v33  ;;  %v826_v33 = vld [vmem:[#allocation8 + $0x128] sm:$0xff]  ;;  %v824_v34 = vld [vmem:[#allocation8 + $0x118] sm:$0xff] }
 0x437   :  { %1766 = vmatprep.subr.bf16.mxu1 %v1765_v36  ;;  %v828_v36 = vld [vmem:[#allocation8 + $0x138] sm:$0xff] }
 0x438   :  { %v1813_v40 = vpack.c.bf16 %v828_v36, %v824_v34 }
 0x4fa   :  { %v1566_v18 = vpop.f32.mrb[2].mxu1 }
 0x4fb   :  { %1932 = vrcp.f32 %v1566_v18  ;;  %v573_v19 = vpop.f32.mrb[3].mxu1  ;;  %v815_v18 = vld [vmem:[#allocation8 + $0xd0] sm:$0xff] }
 0x4fc   :  { %1934 = vrcp.f32 %v573_v19  ;;  %v819_v19 = vld [vmem:[#allocation8 + $0xf0] sm:$0xff] }
 0x505   :  { %v1933_v20 = vpop.eup %1932 }
 0x506   :  { %v1935_v21 = vpop.eup %1934  ;;  %v585_v23 = vmul.f32 %v1933_v20, %v1931_v54  ;;  %v801_v54 = vld [vmem:[#allocation8 + $0x60] sm:$0xff]  ;;  %v1779_v20 = vpack.c.bf16 %v817_v16, %v813_v14 }
 0x507   :  { %v584_v22 = vmul.f32 %v1935_v21, %v1929_v53  ;;  %v797_v53 = vld [vmem:[#allocation8 + $0x40] sm:$0xff]  ;;  %v1811_v21 = vpack.c.bf16 %v819_v19, %v815_v18  ;;  %v851_v18 = vld [vmem:[#allocation8 + $0x1f0] sm:$0xff] }
 0x508   :  { %v1771_v56 = vpack.c.bf16 %v801_v54, %v797_v53  ;;  %v849_v16 = vld [vmem:[#allocation8 + $0x1e0] sm:$0xff] }
 0x509   :  { %1583 = vmatprep.mubr.msk.f32.mxu1 %vm480_vm0, %v584_v22  ;;  %v1795_v19 = vpack.c.bf16 %v849_v16, %v845_v13  ;;  %v1155_v13 = vld [vmem:[#allocation10 + $0x1b0] sm:$0xff]  ;;  %v1156_v16 = vld [vmem:[#allocation10 + $0x1b8] sm:$0xff] }
 0x50a   :  { %1584 = vmatmul.mubr.msk.f32.vlgmr.msra.gmra.mrb[4].mxu1 %vm480_vm0, %v585_v23 }
 0x50b   :  { %939 = vmatprep.mubr.f32.mxu1 %v2155_v15  ;;  %1768 = vmatpush1.bf16.msra.mxu1 %v1767_v42  ;;  %v823_v42 = vld [vmem:[#allocation8 + $0x110] sm:$0xff] }
 0x50c   :  { %v1815_v44 = vpack.c.bf16 %v827_v43, %v823_v42 }
 0x5dd   :  { %v1585_v24 = vpop.f32.mrb[4].mxu1 }
 0x5de   :  { %v658_v25 = vpop.f32.mrb[5].mxu1 }
 0x5df   :  { %1618 = vmatprep.mubr.f32.mxu0 %v658_v25 }
 0x5e0   :  { %1619 = vmatmul.mubr.f32.vlgmr.msra.gmra.mrb[6].mxu0 %v1585_v24 }
 0x5e1   :  { %1016 = vmatprep.mubr.f32.mxu0 %v2155_v15  ;;  %1800 = vmatpush1.bf16.msra.mxu0 %v1799_v46  ;;  %v834_v46 = vld [vmem:[#allocation8 + $0x168] sm:$0xff] }
 0x5e2   :  { %1802 = vmatprep.subr.bf16.mxu0 %v1801_v52  ;;  %v833_v52 = vld [vmem:[#allocation8 + $0x160] sm:$0xff] }
 0x5e5   :  { %1804 = vmatpush1.bf16.msra.mxu0 %v1803_v60  ;;  %v840_v60 = vld [vmem:[#allocation8 + $0x198] sm:$0xff] }
 0x5e6   :  { %1806 = vmatprep.subr.bf16.mxu0 %v1805_v3  ;;  %v841_v3 = vld [vmem:[#allocation8 + $0x1a0] sm:$0xff] }
 0x5e7   :  { %v1791_v5 = vpack.c.bf16 %v841_v3, %v837_v2  ;;  %v1154_v3 = vld [vmem:[#allocation10 + $0x1a8] sm:$0xff] }
 0x5e9   :  { %1808 = vmatpush1.bf16.msra.mxu0 %v1807_v11  ;;  %v848_v11 = vld [vmem:[#allocation8 + $0x1d8] sm:$0xff] }
 0x5ea   :  { %1810 = vmatprep.subr.bf16.mxu0 %v1809_v17  ;;  %v847_v17 = vld [vmem:[#allocation8 + $0x1d0] sm:$0xff] }
 0x5ed   :  { %1812 = vmatpush1.bf16.msra.mxu0 %v1811_v21  ;;  %v1117_v21 = vld [vmem:[#allocation10 + $0x80] sm:$0xff] }
 0x5ee   :  { %1814 = vmatprep.subr.bf16.mxu0 %v1813_v40  ;;  %v1133_v40 = vld [vmem:[#allocation10 + $0x100] sm:$0xff] }
 0x5f1   :  { %1816 = vmatpush1.bf16.msra.mxu0 %v1815_v44  ;;  %v1831_v44 = vpack.c.bf16 %v1102_v39, %v1101_v38  ;;  %v1127_v39 = vld [vmem:[#allocation10 + $0xd0] sm:$0xff] }
 0x6b3   :  { %v1620_v27 = vpop.f32.mrb[6].mxu0 }
 0x6b4   :  { %v762_v28 = vadd.f32 %v1620_v27, %v1350_v26  ;;  %v756_v29 = vpop.f32.mrb[7].mxu0 }
 0x6b5   :  { %v757_v30 = vadd.f32 %v1350_v26, %v756_v29 }
 0x6b6   :  { %v2387_v31 = vadd.f32 %v762_v28, %v2338_v1  ;;  %v798_v1 = vld [vmem:[#allocation8 + $0x48] sm:$0xff] }
 0x6b7   :  { %v2390_v32 = vadd.f32 %v757_v30, %v2335_v0  ;;  %v802_v0 = vld [vmem:[#allocation8 + $0x68] sm:$0xff] }
 0x6b8   :  { %769 = vadd.xlane.f32.xlu1 %v2387_v31  ;;  %v1769_v51 = vpack.c.bf16 %v802_v0, %v798_v1  ;;  %v822_v30 = vld [vmem:[#allocation8 + $0x108] sm:$0xff]  ;;  %v832_v0 = vld [vmem:[#allocation8 + $0x158] sm:$0xff] }
 0x6b9   :  { %767 = vadd.xlane.f32.xlu0 %v2390_v32  ;;  %v1781_v35 = vpack.c.bf16 %v826_v33, %v822_v30  ;;  %v830_v1 = vld [vmem:[#allocation8 + $0x148] sm:$0xff]  ;;  %v1817_v53 = vpack.c.bf16 %v836_v50, %v832_v0  ;;  %v1120_v50 = vld [vmem:[#allocation10 + $0x98] sm:$0xff] }
 0x6ba   :  { %1770 = vmatprep.subr.bf16.mxu1 %v1769_v51  ;;  %v1785_v48 = vpack.c.bf16 %v834_v46, %v830_v1  ;;  %v829_v51 = vld [vmem:[#allocation8 + $0x140] sm:$0xff] }
 0x6bb   :  { %1772 = vmatpush1.bf16.msra.mxu1 %v1771_v56  ;;  %v1787_v54 = vpack.c.bf16 %v833_v52, %v829_v51  ;;  %v835_v56 = vld [vmem:[#allocation8 + $0x170] sm:$0xff]  ;;  %1818 = vmatprep.subr.bf16.mxu0 %v1817_v53  ;;  %v1104_v52 = vld [vmem:[#allocation10 + $0x18] sm:$0xff] }
 0x6bc   :  { %1774 = vmatprep.subr.bf16.mxu1 %v1773_v61  ;;  %v1819_v58 = vpack.c.bf16 %v835_v56, %v831_v55  ;;  %v844_v61 = vld [vmem:[#allocation8 + $0x1b8] sm:$0xff]  ;;  %v1103_v51 = vld [vmem:[#allocation10 + $0x10] sm:$0xff] }
 0x6bd   :  { %v1821_v63 = vpack.c.bf16 %v844_v61, %v840_v60  ;;  %v1151_v53 = vld [vmem:[#allocation10 + $0x190] sm:$0xff]  ;;  %v1152_v55 = vld [vmem:[#allocation10 + $0x198] sm:$0xff]  ;;  %v1105_v61 = vld [vmem:[#allocation10 + $0x20] sm:$0xff] }
 0x6be   :  { %1820 = vmatpush1.bf16.msra.mxu0 %v1819_v58  ;;  %v1135_v56 = vld [vmem:[#allocation10 + $0x110] sm:$0xff]  ;;  %v2414_v58 = vpack.c.bf16 %v1152_v55, %v1151_v53  ;;  %v1130_v53 = vld [vmem:[#allocation10 + $0xe8] sm:$0xff] }
 0x6bf   :  { %1776 = vmatpush1.bf16.msra.mxu1 %v1775_v7  ;;  %v846_v7 = vld [vmem:[#allocation8 + $0x1c8] sm:$0xff]  ;;  %1822 = vmatprep.subr.bf16.mxu0 %v1821_v63  ;;  %v1153_v63 = vld [vmem:[#allocation10 + $0x1a0] sm:$0xff] }
 0x6c0   :  { %1778 = vmatprep.subr.bf16.mxu1 %v1777_v12  ;;  %v1793_v10 = vpack.c.bf16 %v850_v8, %v846_v7  ;;  %v852_v12 = vld [vmem:[#allocation8 + $0x1f8] sm:$0xff]  ;;  %v2420_v6 = vpack.c.bf16 %v1154_v3, %v1153_v63  ;;  %v1123_v8 = vld [vmem:[#allocation10 + $0xb0] sm:$0xff] }
 0x6c1   :  { %v1825_v14 = vpack.c.bf16 %v852_v12, %v848_v11  ;;  %v1107_v11 = vld [vmem:[#allocation10 + $0x30] sm:$0xff]  ;;  %v1108_v12 = vld [vmem:[#allocation10 + $0x38] sm:$0xff] }
 0x6c2   :  { %1824 = vmatpush1.bf16.msra.mxu0 %v1823_v9  ;;  %v1124_v9 = vld [vmem:[#allocation10 + $0xb8] sm:$0xff]  ;;  %v1131_v63 = vld [vmem:[#allocation10 + $0xf0] sm:$0xff] }
 0x6c3   :  { %1780 = vmatpush1.bf16.msra.mxu1 %v1779_v20  ;;  %v1827_v20 = vpack.c.bf16 %v851_v18, %v847_v17  ;;  %1826 = vmatprep.subr.bf16.mxu0 %v1825_v14  ;;  %v1843_v14 = vpack.c.bf16 %v1108_v12, %v1107_v11  ;;  %v1139_v17 = vld [vmem:[#allocation10 + $0x130] sm:$0xff]  ;;  %v1140_v18 = vld [vmem:[#allocation10 + $0x138] sm:$0xff] }
 0x6c4   :  { %1782 = vmatprep.subr.bf16.mxu1 %v1781_v35  ;;  %v1132_v3 = vld [vmem:[#allocation10 + $0xf8] sm:$0xff]  ;;  %v1147_v11 = vld [vmem:[#allocation10 + $0x170] sm:$0xff] }
 0x6c6   :  { %1828 = vmatpush1.bf16.msra.mxu0 %v1827_v20  ;;  %v2428_v20 = vpack.c.bf16 %v1140_v18, %v1139_v17  ;;  %v853_v17 = vld [vmem:[%s2543_s6] sm:$0xf]  ;;  %v869_v18 = vsub.s32 3, %v2355_v41 }
 0x6c7   :  { %1784 = vmatpush1.bf16.msra.mxu1 %v1783_v37  ;;  %v1134_v37 = vld [vmem:[#allocation10 + $0x108] sm:$0xff] }
 0x6c8   :  { %1786 = vmatprep.subr.bf16.mxu1 %v1785_v48  ;;  %v2408_v1 = vpack.c.bf16 %v1134_v37, %v1133_v40  ;;  %v1119_v48 = vld [vmem:[#allocation10 + $0x90] sm:$0xff]  ;;  %v1128_v40 = vld [vmem:[#allocation10 + $0xd8] sm:$0xff] }
 0x6c9   :  { %v1849_v37 = vpack.c.bf16 %v1128_v40, %v1127_v39 }
 0x6cb   :  { %1788 = vmatpush1.bf16.msra.mxu1 %v1787_v54  ;;  %v1835_v54 = vpack.c.bf16 %v1104_v52, %v1103_v51  ;;  %v1129_v52 = vld [vmem:[#allocation10 + $0xe0] sm:$0xff] }
 0x6cc   :  { %1790 = vmatprep.subr.bf16.mxu1 %v1789_v62  ;;  %v1106_v62 = vld [vmem:[#allocation10 + $0x28] sm:$0xff]  ;;  %v1853_v55 = vpack.c.bf16 %v1130_v53, %v1129_v52 }
 0x6cd   :  { %v1839_v2 = vpack.c.bf16 %v1106_v62, %v1105_v61  ;;  %v1145_v61 = vld [vmem:[#allocation10 + $0x160] sm:$0xff]  ;;  %v1146_v62 = vld [vmem:[#allocation10 + $0x168] sm:$0xff] }
 0x6cf   :  { %1792 = vmatpush1.bf16.msra.mxu1 %v1791_v5  ;;  %v1138_v5 = vld [vmem:[#allocation10 + $0x128] sm:$0xff] }
 0x6d0   :  { %1794 = vmatprep.subr.bf16.mxu1 %v1793_v10  ;;  %v2422_v7 = vpack.c.bf16 %v1138_v5, %v1137_v4  ;;  %v1841_v10 = vpack.c.bf16 %v1124_v9, %v1123_v8  ;;  %v1115_v4 = vld [vmem:[#allocation10 + $0x70] sm:$0xff]  ;;  %v1116_v5 = vld [vmem:[#allocation10 + $0x78] sm:$0xff]  ;;  %v1857_v8 = vpack.c.bf16 %v1132_v3, %v1131_v63 }
 0x6d1   :  { %v1163_v9 = vld [vmem:[#allocation10 + $0x1f0] sm:$0xff]  ;;  %v1859_v12 = vpack.c.bf16 %v1116_v5, %v1115_v4 }
 0x6d3   :  { %1796 = vmatpush1.bf16.msra.mxu1 %v1795_v19  ;;  %v2426_v19 = vpack.c.bf16 %v1156_v16, %v1155_v13 }
 0x745   :  { %v770_v22 = vpop.xlane.xlu1 %769 }
 0x746   :  { %v772_v23 = vmul.f32 0.0078125, %v770_v22  ;;  %v768_v24 = vpop.xlane.xlu0 %767  ;;  %v1118_v22 = vld [vmem:[#allocation10 + $0x88] sm:$0xff] }
 0x747   :  { %v771_v25 = vmul.f32 0.0078125, %v768_v24  ;;  %v1149_v24 = vld [vmem:[#allocation10 + $0x180] sm:$0xff] }
 0x748   :  { %v2395_v26 = vsub.f32 %v2387_v31, %v772_v23  ;;  %v1829_v23 = vpack.c.bf16 %v1118_v22, %v1117_v21  ;;  %v1125_v21 = vld [vmem:[#allocation10 + $0xc0] sm:$0xff]  ;;  %v1126_v22 = vld [vmem:[#allocation10 + $0xc8] sm:$0xff] }
 0x749   :  { %v2398_v27 = vsub.f32 %v2390_v32, %v771_v25  ;;  %v1150_v25 = vld [vmem:[#allocation10 + $0x188] sm:$0xff] }
 0x74a   :  { %v776_v28 = vmul.f32 %v2395_v26, %v2395_v26  ;;  %1830 = vmatprep.subr.bf16.mxu1 %v1829_v23  ;;  %v1845_v23 = vpack.c.bf16 %v1126_v22, %v1125_v21  ;;  %v858_v21 = vrot.slane %v853_v17, %v214_v45  ;;  %v866_v22 = vrot.slane %v853_v17, %v222_v49 }
 0x74b   :  { %v775_v29 = vmul.f32 %v2398_v27, %v2398_v27 }
 0x74c   :  { %779 = vadd.xlane.f32.xlu1 %v776_v28  ;;  %v2404_v28 = vpack.c.bf16 %v1150_v25, %v1149_v24  ;;  %v1109_v24 = vld [vmem:[#allocation10 + $0x40] sm:$0xff]  ;;  %v1110_v25 = vld [vmem:[#allocation10 + $0x48] sm:$0xff] }
 0x74d   :  { %777 = vadd.xlane.f32.xlu0 %v775_v29 }
 0x74e   :  { %1862 = vmatprep.subr.bf16.mxu0 %v2404_v28 }
 0x7d9   :  { %v780_v29 = vpop.xlane.xlu1 %779 }
 0x7da   :  { %v782_v30 = vmul.f32 0.0078125, %v780_v29  ;;  %v778_v33 = vpop.xlane.xlu0 %777  ;;  %v1157_v29 = vld [vmem:[#allocation10 + $0x1c0] sm:$0xff] }
 0x7db   :  { %v781_v34 = vmul.f32 0.0078125, %v778_v33  ;;  %v1158_v33 = vld [vmem:[#allocation10 + $0x1c8] sm:$0xff] }
 0x7dc   :  { %v784_v35 = vadd.f32 1e-05, %v782_v30  ;;  %v1847_v30 = vpack.c.bf16 %v1110_v25, %v1109_v24  ;;  %v870_v24 = vrot.slane %v853_v17, %v869_v18 }
 0x7dd   :  { %v783_v36 = vadd.f32 1e-05, %v781_v34  ;;  %v1141_v34 = vld [vmem:[#allocation10 + $0x140] sm:$0xff] }
 0x7df   :  { %1936 = vrsqrt.f32 %v783_v36  ;;  %v2432_v36 = vpack.c.bf16 %v1158_v33, %v1157_v29 }
 0x7e0   :  { %1938 = vrsqrt.f32 %v784_v35  ;;  %v1142_v35 = vld [vmem:[#allocation10 + $0x148] sm:$0xff] }
 0x7e1   :  { %v2434_v38 = vpack.c.bf16 %v1142_v35, %v1141_v34 }
 0x7e9   :  { %v1937_v42 = vpop.eup %1936 }
 0x7ea   :  { %v787_v43 = vmul.f32 %v1937_v42, %v2398_v27  ;;  %v1939_v46 = vpop.eup %1938  ;;  %v1833_v27 = vpack.c.bf16 %v1120_v50, %v1119_v48  ;;  %v1111_v42 = vld [vmem:[#allocation10 + $0x50] sm:$0xff]  ;;  %v1144_v50 = vld [vmem:[#allocation10 + $0x158] sm:$0xff] }
 0x7eb   :  { %v788_v0 = vmul.f32 %v1939_v46, %v2395_v26  ;;  %v1121_v26 = vld [vmem:[#allocation10 + $0xa0] sm:$0xff]  ;;  %v1143_v48 = vld [vmem:[#allocation10 + $0x150] sm:$0xff] }
 0x7ec   :  { %940 = vmatmul.mubr.f32.vlgmr.msra.gmra.mrb[6].mxu1 %v787_v43  ;;  %1017 = vmatmul.mubr.f32.vlgmr.msra.gmra.mrb[8].mxu0 %v787_v43  ;;  %v1837_v60 = vpack.c.bf16 %v1122_v59, %v1121_v26  ;;  %v1112_v43 = vld [vmem:[#allocation10 + $0x58] sm:$0xff]  ;;  %v2440_v51 = vpack.c.bf16 %v1144_v50, %v1143_v48  ;;  %v1162_v26 = vld [vmem:[#allocation10 + $0x1e8] sm:$0xff] }
 0x7ed   :  { %945 = vmatprep.mubr.f32.mxu1 %v2155_v15  ;;  %1022 = vmatprep.mubr.f32.mxu0 %v2155_v15  ;;  %v2416_v15 = vpack.c.bf16 %v1136_v57, %v1135_v56  ;;  %v1851_v46 = vpack.c.bf16 %v1112_v43, %v1111_v42  ;;  %v1114_v56 = vld [vmem:[#allocation10 + $0x68] sm:$0xff]  ;;  %v1161_v57 = vld [vmem:[#allocation10 + $0x1e0] sm:$0xff] }
 0x7ee   :  { %1832 = vmatpush3.bf16.msra.mxu1 %v1831_v44  ;;  %1864 = vmatpush3.bf16.msra.mxu0 %v2408_v1  ;;  %v1159_v44 = vld [vmem:[#allocation10 + $0x1d0] sm:$0xff] }
 0x7ef   :  { %1834 = vmatprep.subr.bf16.mxu1 %v1833_v27  ;;  %1866 = vmatprep.subr.bf16.mxu0 %v2414_v58 }
 0x7f0   :  { %946 = vmatmul.mubr.f32.gmra.mrb[8].mxu1 %v788_v0  ;;  %1023 = vmatmul.mubr.f32.gmra.mrb[10].mxu0 %v788_v0  ;;  %v1160_v0 = vld [vmem:[#allocation10 + $0x1d8] sm:$0xff] }
 0x7f1   :  { %v2438_v27 = vpack.c.bf16 %v1160_v0, %v1159_v44 }
 0x7f2   :  { %1836 = vmatpush3.bf16.msra.mxu1 %v1835_v54  ;;  %1868 = vmatpush3.bf16.msra.mxu0 %v2416_v15  ;;  %v1113_v54 = vld [vmem:[#allocation10 + $0x60] sm:$0xff] }
 0x7f3   :  { %1838 = vmatprep.subr.bf16.mxu1 %v1837_v60  ;;  %1870 = vmatprep.subr.bf16.mxu0 %v2420_v6  ;;  %v1855_v59 = vpack.c.bf16 %v1114_v56, %v1113_v54  ;;  %v2443_v60 = vpack.c.bf16 %v1162_v26, %v1161_v57 }
 0x7f6   :  { %1840 = vmatpush3.bf16.msra.mxu1 %v1839_v2  ;;  %1872 = vmatpush3.bf16.msra.mxu0 %v2422_v7  ;;  %v2446_v2 = vpack.c.bf16 %v1146_v62, %v1145_v61 }
 0x7f7   :  { %1842 = vmatprep.subr.bf16.mxu1 %v1841_v10  ;;  %1874 = vmatprep.subr.bf16.mxu0 %v2426_v19  ;;  %v1164_v10 = vld [vmem:[#allocation10 + $0x1f8] sm:$0xff] }
 0x7f8   :  { %v2449_v13 = vpack.c.bf16 %v1164_v10, %v1163_v9 }
 0x7fa   :  { %1844 = vmatpush3.bf16.msra.mxu1 %v1843_v14  ;;  %1876 = vmatpush3.bf16.msra.mxu0 %v2428_v20  ;;  %v1148_v14 = vld [vmem:[#allocation10 + $0x178] sm:$0xff] }
 0x7fb   :  { %1846 = vmatprep.subr.bf16.mxu1 %v1845_v23  ;;  %1878 = vmatprep.subr.bf16.mxu0 %v2432_v36  ;;  %v2452_v16 = vpack.c.bf16 %v1148_v14, %v1147_v11  ;;  %v862_v23 = vrot.slane %v853_v17, %v218_v47 }
 0x7fe   :  { %1848 = vmatpush3.bf16.msra.mxu1 %v1847_v30  ;;  %1880 = vmatpush3.bf16.msra.mxu0 %v2434_v38 }
 0x7ff   :  { %1850 = vmatprep.subr.bf16.mxu1 %v1849_v37  ;;  %1882 = vmatprep.subr.bf16.mxu0 %v2438_v27 }
 0x802   :  { %1852 = vmatpush3.bf16.msra.mxu1 %v1851_v46  ;;  %1884 = vmatpush3.bf16.msra.mxu0 %v2440_v51 }
 0x803   :  { %1854 = vmatprep.subr.bf16.mxu1 %v1853_v55  ;;  %1886 = vmatprep.subr.bf16.mxu0 %v2443_v60 }
 0x806   :  { %1856 = vmatpush3.bf16.msra.mxu1 %v1855_v59  ;;  %1888 = vmatpush3.bf16.msra.mxu0 %v2446_v2 }
 0x807   :  { %1858 = vmatprep.subr.bf16.mxu1 %v1857_v8  ;;  %1890 = vmatprep.subr.bf16.mxu0 %v2449_v13 }
 0x80a   :  { %1860 = vmatpush3.bf16.msra.mxu1 %v1859_v12  ;;  %1892 = vmatpush3.bf16.msra.mxu0 %v2452_v16 }
 0x80b   :  { %1893 = vmatprep.subr.bf16.mxu1 %v2404_v28 }
 0x8bf   :  { %v941_v25 = vpop.f32.mrb[6].mxu1  ;;  %v1018_v28 = vpop.f32.mrb[8].mxu0 }
 0x8c0   :  { %v2467_v29 = vadd.f32 %v941_v25, %v858_v21  ;;  %v2469_v30 = vadd.f32 %v1018_v28, %v866_v22  ;;  %v943_v33 = vpop.f32.mrb[7].mxu1  ;;  %v1020_v34 = vpop.f32.mrb[9].mxu0 }
 0x8c1   :  { %v944_v35 = vadd.f32 %v943_v33, %v862_v23  ;;  %v2471_v39 = vadd.f32 %v1020_v34, %v870_v24 }
 0x8c2   :  { %v1037_v45 = vmul.f32 0.44715, %v2467_v29  ;;  %v1039_v40 = vmul.f32 0.44715, %v2469_v30 }
 0x8c3   :  { %v1038_v49 = vmul.f32 0.44715, %v944_v35  ;;  %v1040_v41 = vmul.f32 0.44715, %v2471_v39  ;;  %v947_v47 = vpop.f32.mrb[8].mxu1  ;;  %v1024_v37 = vpop.f32.mrb[10].mxu0 }
 0x8c4   :  { %v1045_v42 = vmul.f32 %v1037_v45, %v2467_v29  ;;  %v1047_v43 = vmul.f32 %v1039_v40, %v2469_v30  ;;  %v2478_v44 = vadd.f32 %v947_v47, %v858_v21  ;;  %v949_v46 = vpop.f32.mrb[9].mxu1  ;;  %v1026_v0 = vpop.f32.mrb[11].mxu0  ;;  %v1025_v45 = vadd.f32 %v1024_v37, %v866_v22 }
 0x8c5   :  { %v1046_v48 = vmul.f32 %v1038_v49, %v944_v35  ;;  %v950_v50 = vadd.f32 %v949_v46, %v862_v23  ;;  %v2480_v52 = vadd.f32 %v1026_v0, %v870_v24  ;;  %v1048_v55 = vmul.f32 %v1040_v41, %v2471_v39 }
 0x8c6   :  { %v1053_v53 = vmul.f32 %v1045_v42, %v2467_v29  ;;  %v1055_v54 = vmul.f32 %v1047_v43, %v2469_v30  ;;  %v1041_v56 = vmul.f32 0.44715, %v2478_v44  ;;  %v1043_v41 = vmul.f32 0.44715, %v1025_v45 }
 0x8c7   :  { %v1042_v57 = vmul.f32 0.44715, %v950_v50  ;;  %v1044_v26 = vmul.f32 0.44715, %v2480_v52  ;;  %v1054_v59 = vmul.f32 %v1046_v48, %v944_v35  ;;  %v1056_v10 = vmul.f32 %v1048_v55, %v2471_v39 }
 0x8c8   :  { %v1061_v61 = vadd.f32 %v1053_v53, %v2467_v29  ;;  %v1063_v62 = vadd.f32 %v1055_v54, %v2469_v30  ;;  %v1049_v63 = vmul.f32 %v1041_v56, %v2478_v44  ;;  %v1030_v43 = vmul.f32 0.5, %v944_v35 }
 0x8c9   :  { %v1050_v3 = vmul.f32 %v1042_v57, %v950_v50  ;;  %v1062_v4 = vadd.f32 %v1054_v59, %v944_v35  ;;  %v1052_v9 = vmul.f32 %v1044_v26, %v2480_v52  ;;  %v1064_v14 = vadd.f32 %v1056_v10, %v2471_v39 }
 0x8ca   :  { %v1069_v5 = vmul.f32 0.7978845, %v1061_v61  ;;  %v1071_v8 = vmul.f32 0.7978845, %v1063_v62  ;;  %v1057_v17 = vmul.f32 %v1049_v63, %v2478_v44  ;;  %v1029_v48 = vmul.f32 0.5, %v2467_v29 }
 0x8cb   :  { %v1070_v11 = vmul.f32 0.7978845, %v1062_v4  ;;  %v1058_v12 = vmul.f32 %v1050_v3, %v950_v50  ;;  %v1072_v21 = vmul.f32 0.7978845, %v1064_v14  ;;  %v1060_v24 = vmul.f32 %v1052_v9, %v2480_v52 }
 0x8cc   :  { %1940 = vtanh.f32 %v1069_v5  ;;  %v1065_v23 = vadd.f32 %v1057_v17, %v2478_v44  ;;  %v1051_v54 = vmul.f32 %v1043_v41, %v1025_v45  ;;  %v1032_v56 = vmul.f32 0.5, %v2471_v39 }
 0x8cd   :  { %1942 = vtanh.f32 %v1071_v8  ;;  %v1066_v18 = vadd.f32 %v1058_v12, %v950_v50  ;;  %v1068_v33 = vadd.f32 %v1060_v24, %v2480_v52  ;;  %v1031_v22 = vmul.f32 0.5, %v2469_v30 }
 0x8ce   :  { %1944 = vtanh.f32 %v1070_v11  ;;  %v1073_v28 = vmul.f32 0.7978845, %v1065_v23  ;;  %v1034_v62 = vmul.f32 0.5, %v950_v50  ;;  %v1033_v29 = vmul.f32 0.5, %v2478_v44 }
 0x8cf   :  { %v1074_v25 = vmul.f32 0.7978845, %v1066_v18  ;;  %1946 = vtanh.f32 %v1072_v21  ;;  %v1076_v34 = vmul.f32 0.7978845, %v1068_v33  ;;  %v1059_v5 = vmul.f32 %v1051_v54, %v1025_v45 }
 0x8d0   :  { %v1036_v8 = vmul.f32 0.5, %v2480_v52 }
 0x8d1   :  { %1948 = vtanh.f32 %v1074_v25  ;;  %v1067_v10 = vadd.f32 %v1059_v5, %v1025_v45 }
 0x8d2   :  { %1950 = vtanh.f32 %v1073_v28 }
 0x8d3   :  { %1952 = vtanh.f32 %v1076_v34  ;;  %v1075_v44 = vmul.f32 0.7978845, %v1067_v10 }
 0x8d5   :  { %1954 = vtanh.f32 %v1075_v44 }
 0x8d6   :  { %v1941_v40 = vpop.eup %1940 }
 0x8d7   :  { %v1943_v49 = vpop.eup %1942  ;;  %v1085_v42 = vadd.f32 1.0, %v1941_v40 }
 0x8d8   :  { %v1945_v47 = vpop.eup %1944  ;;  %v1087_v53 = vadd.f32 1.0, %v1943_v49 }
 0x8d9   :  { %v1086_v46 = vadd.f32 1.0, %v1945_v47  ;;  %v1947_v0 = vpop.eup %1946  ;;  %v1093_v37 = vmul.f32 %v1085_v42, %v1029_v48 }
 0x8da   :  { %v1088_v57 = vadd.f32 1.0, %v1947_v0  ;;  %v1095_v3 = vmul.f32 %v1087_v53, %v1031_v22 }
 0x8db   :  { %v1094_v55 = vmul.f32 %v1086_v46, %v1030_v43  ;;  %v1949_v26 = vpop.eup %1948 }
 0x8dc   :  { %v1951_v59 = vpop.eup %1950  ;;  %v1096_v61 = vmul.f32 %v1088_v57, %v1032_v56  ;;  %v1090_v63 = vadd.f32 1.0, %v1949_v26 }
 0x8dd   :  { %1236 = vmatprep.mubr.f32.mxu1 %v1094_v55  ;;  %v1953_v35 = vpop.eup %1952  ;;  %v1089_v4 = vadd.f32 1.0, %v1951_v59 }
 0x8de   :  { %1237 = vmatmul.mubr.f32.vlgmr.msra.gmra.mrb[10].mxu1 %v1093_v37  ;;  %1311 = vmatprep.mubr.f32.mxu0 %v1096_v61  ;;  %v1098_v39 = vmul.f32 %v1090_v63, %v1034_v62  ;;  %v1092_v30 = vadd.f32 1.0, %v1953_v35 }
 0x8df   :  { %1901 = vmatpush3.bf16.msra.mxu1 %v2408_v1  ;;  %1312 = vmatmul.mubr.f32.vlgmr.msra.gmra.mrb[12].mxu0 %v1095_v3  ;;  %v1097_v9 = vmul.f32 %v1089_v4, %v1033_v29  ;;  %v1955_v1 = vpop.eup %1954 }
 0x8e0   :  { %1894 = vmatprep.subr.bf16.mxu1 %v2414_v58  ;;  %1241 = vmatprep.mubr.f32.mxu1 %v1098_v39  ;;  %v1100_v50 = vmul.f32 %v1092_v30, %v1036_v8  ;;  %v1091_v58 = vadd.f32 1.0, %v1955_v1 }
 0x8e2   :  { %1242 = vmatmul.mubr.f32.gmra.mrb[12].mxu1 %v1097_v9 }
 0x8e3   :  { %1902 = vmatpush3.bf16.msra.mxu1 %v2416_v15  ;;  %1316 = vmatprep.mubr.f32.mxu1 %v1100_v50  ;;  %v1035_v15 = vmul.f32 0.5, %v1025_v45 }
 0x8e4   :  { %1895 = vmatprep.subr.bf16.mxu1 %v2420_v6 }
 0x8e5   :  { %v1099_v6 = vmul.f32 %v1091_v58, %v1035_v15 }
 0x8e7   :  { %1903 = vmatpush3.bf16.msra.mxu1 %v2422_v7 }
 0x8e8   :  { %1896 = vmatprep.subr.bf16.mxu1 %v2426_v19  ;;  %v1351_v19 = vld [vmem:[%s2545_s8] ss:$0 sm:$0xff]  ;;  %s2110_s8 = scalar_lea.vmem %s1332_s3, 256 }
 0x8e9   :  { %p2111_p0 = scmp.ne.s32.totalorder %s1332_s3, %s2110_s8  ;;  %p2116_p2 = scmp.lt.s32.totalorder %s2110_s8, %s2110_s8 }
 0x8eb   :  { %1904 = vmatpush3.bf16.msra.mxu1 %v2428_v20  ;;  %p2117_p3 = por %p2116_p2, %p2115_p1 }
 0x8ec   :  { %1897 = vmatprep.subr.bf16.mxu1 %v2432_v36 }
 0x8ed   :  { %p2118_p4 = pnand %p2117_p3, %p2111_p0 }
 0x8ef   :  { %1905 = vmatpush3.bf16.msra.mxu1 %v2434_v38 }
 0x8f0   :  { %1898 = vmatprep.subr.bf16.mxu1 %v2438_v27 }
 0x8f3   :  { %1906 = vmatpush3.bf16.msra.mxu1 %v2440_v51 }
 0x8f4   :  { %1899 = vmatprep.subr.bf16.mxu1 %v2443_v60 }
 0x8f7   :  { %1907 = vmatpush3.bf16.msra.mxu1 %v2446_v2 }
 0x8f8   :  { %1900 = vmatprep.subr.bf16.mxu1 %v2449_v13 }
 0x8fb   :  { %1908 = vmatpush3.bf16.msra.mxu1 %v2452_v16 }
 0x8fe   :  { %1317 = vmatmul.mubr.f32.vlgmr.msra.gmra.mrb[14].mxu1 %v1099_v6 }
 0x9b1   :  { %v1450_v7 = vpop.f32.mrb[10].mxu1 }
 0x9b2   :  { %v1451_v20 = vpop.f32.mrb[11].mxu1  ;;  %v1488_v36 = vpop.f32.mrb[12].mxu0 }
 0x9b3   :  { %v1452_v38 = vadd.f32 %v1451_v20, %v1450_v7  ;;  %v1489_v27 = vpop.f32.mrb[13].mxu0 }
 0x9b4   :  { %v1490_v60 = vadd.f32 %v1489_v27, %v1488_v36 }
 0x9b5   :  { %v1239_v51 = vadd.f32 %v1452_v38, %v1351_v19  ;;  %v1453_v2 = vpop.f32.mrb[12].mxu1 }
 0x9b6   :  { %v1454_v52 = vpop.f32.mrb[13].mxu1 }
 0x9b7   :  { %v1314_v13 = vadd.f32 %v1490_v60, %v1239_v51  ;;  %v1455_v11 = vadd.f32 %v1454_v52, %v1453_v2 }
 0x9b9   :  { %v1322_v12 = vadd.f32 %v1314_v13, %v2390_v32  ;;  %v1244_v17 = vadd.f32 %v1455_v11, %v1351_v19 }
 0x9bb   :  { %1324 = vst [vmem:[#allocation14] sm:$0xff] %v1322_v12 }
 0x9d1   :  { %v1491_v16 = vpop.f32.mrb[14].mxu1 }
 0x9d2   :  { %v1492_v14 = vpop.f32.mrb[15].mxu1 }
 0x9d3   :  { %v1493_v18 = vadd.f32 %v1492_v14, %v1491_v16 }
 0x9d5   :  { %v1319_v21 = vadd.f32 %v1493_v18, %v1244_v17 }
 0x9d7   :  { %v1323_v23 = vadd.f32 %v1319_v21, %v2387_v31 }
 0x9d9   :  { %1325 = vst [vmem:[#allocation14 + $0x8] sm:$0xff] %v1323_v23 }
 0x9da   :  { %2121 = shalt.err (!%p2118_p4)
}
 0x9db   :  { %s2122_s5 = scalar_lea.hbm %s2549_s12, 256 }
 0x9dc   :  { %p2123_p5 = scmp.ne.s32.totalorder %s2549_s12, %s2122_s5  ;;  %p2126_p6 = scmp.lt.u32.totalorder %s2122_s5, %s2549_s12 }
 0x9de   :  { %p2128_p7 = pnand %p2126_p6, %p2123_p5 }
 0x9e0   :  { %2131 = shalt.err (!%p2128_p7)
}
 0x9e1   :  { %1337 = dma.vmem_to_hbm [thread:$0]  %s1332_s3, 256, %s2549_s12, [#allocation4], %s2150_s18, %s2150_s18, %s2151_s25  }
 0x9e2   :  { %2140 = dma.done.wait [#allocation4], 256  }
 0x9e3   :  { %2141 = vsyncadd [#allocation4], 4294967040 }
 0x9e4   :  { %1341 = vsyncpa [#allocation3], 1 }
 0x9e5   :  { %1342 = vsyncpa [#allocation6], 1 }
 0x9e6   :  { %1343 = vsyncpa [#allocation9], 1 }
 0x9e7   :  { %1344 = vsyncpa [#allocation12], 1 }
 0x9e8   :  { %1345 = vsyncpa [#allocation4], 1 }

</bundles_post_ra>
